<compile_context>
chip_gen: v7x
topology: tpu7x:2x2x1
jax: 0.10.0
libtpu: 0.0.40
codegen_flags: <defaults>
</compile_context>

<pallas_src>
import math

import jax
import jax.numpy as jnp
from jax.experimental import pallas as pl
from jax.experimental.pallas import tpu as pltpu

EPS = 1e-10


def neurallp_kernel(q_ref, wih_ref, whh_ref, bl_ref, wlwT_ref, wlb_ref,
                    mem0_ref, adj_ref, out_ref):
    """get_t_output recurrence for one block of unique (h, r) queries.

    q_ref:    (T, Bb, D)  bf16   query embeddings (time, batch, feature)
    wih_ref:  (D, 4D)     bf16   W_ih^T (PyTorch gate order i, f, g, o)
    whh_ref:  (D, 4D)     bf16   W_hh^T
    bl_ref:   (1, 4D)     f32    b_ih + b_hh
    wlwT_ref: (D, R)      f32    weight_linear weight, transposed
    wlb_ref:  (1, R)      f32    weight_linear bias
    mem0_ref: (Bb, Np)    f32    one-hot of head entities (initial memory)
    adj_ref:  (R*Np, Np)  bf16   adj_stacked[r*Np + in, out] = #edges(in -r-> out)
    out_ref:  (Bb, Np)    f32    final per-node scores
    """
    T, Bb, D = q_ref.shape
    Np = mem0_ref.shape[1]
    R = wlb_ref.shape[1]

    wih = wih_ref[...]                 # (D, 4D) bf16
    whh = whh_ref[...]                 # (D, 4D) bf16
    b_l = bl_ref[...]                  # (1, 4D) f32
    wlwT = wlwT_ref[...]               # (D, R)
    wlb = wlb_ref[...]                 # (1, R)
    adj = adj_ref[...]                 # (R*Np, Np) bf16

    # ---------------- LSTM (two accumulating bf16 dots per step) ------------
    h = jnp.zeros((Bb, D), jnp.float32)
    c = jnp.zeros((Bb, D), jnp.float32)
    hs = []
    for t in range(T):                                            # static, T small
        x_t = q_ref[t]                                            # (Bb, D) bf16
        gates = (jnp.dot(x_t, wih, preferred_element_type=jnp.float32)
                 + jnp.dot(h.astype(jnp.bfloat16), whh,
                           preferred_element_type=jnp.float32)
                 + b_l)                                           # (Bb, 4D) f32
        i_g = jax.nn.sigmoid(gates[:, 0 * D:1 * D])
        f_g = jax.nn.sigmoid(gates[:, 1 * D:2 * D])
        g_g = jnp.tanh(gates[:, 2 * D:3 * D])
        o_g = jax.nn.sigmoid(gates[:, 3 * D:4 * D])
        c = f_g * c + i_g * g_g
        h = o_g * jnp.tanh(c)
        hs.append(h)

    # ------------- NeuralLP attention + relational propagation --------------
    mems = [mem0_ref[...]]                                        # list of (Bb, Np)
    for i in range(T):                                            # static, T small
        key = hs[i]                                               # (Bb, D)

        # attention over hidden states t = 0..i  (value = hidden[:i+1])
        scores = jnp.concatenate(
            [jnp.sum(hs[t] * key, axis=-1, keepdims=True) for t in range(i + 1)],
            axis=-1)                                              # (Bb, i+1)
        m = jnp.max(scores, axis=-1, keepdims=True)
        e = jnp.exp(scores - m)
        attn = e * pl.reciprocal(jnp.sum(e, axis=-1, keepdims=True), approx=True)

        # attended memory: inp[b, n] = sum_t attn[b, t] * memory[t][b, n]
        inp = attn[:, 0:1] * mems[0]
        for t in range(1, i + 1):
            inp = inp + attn[:, t:t + 1] * mems[t]                # (Bb, Np) f32

        # per-relation mixture weights: softmax over relations
        logits = jnp.dot(key, wlwT,
                         preferred_element_type=jnp.float32) + wlb       # (Bb, R)
        lmax = jnp.max(logits, axis=-1, keepdims=True)
        lexp = jnp.exp(logits - lmax)
        w_attn = lexp * pl.reciprocal(
            jnp.sum(lexp, axis=-1, keepdims=True), approx=True)          # (Bb, R)

        # relational message passing: relation weighting folded into the MXU.
        # lhs[b, r*Np + in] = w_attn[b, r] * inp[b, in]; one matmul, K = R*Np.
        lhs = jnp.concatenate(
            [inp * w_attn[:, r:r + 1] for r in range(R)],
            axis=-1).astype(jnp.bfloat16)                          # (Bb, R*Np)
        out = jnp.dot(lhs, adj, preferred_element_type=jnp.float32)  # (Bb, Np)

        # normalize over nodes (clamp(min=eps)); exact divide for fidelity
        s = jnp.sum(out, axis=-1, keepdims=True)                   # (Bb, 1)
        out = out / jnp.maximum(s, EPS)

        if i + 1 < T:
            mems.append(out)
        else:
            out_ref[...] = out          # last step goes straight to the output


def run_neurallp_kernel(q_tbd, w_ihT, w_hhT, b_lstm, wlwT, wlb, mem0, adj_stacked):
    T, B, D = q_tbd.shape
    Np = mem0.shape[1]
    R = wlb.shape[1]
    RNp = adj_stacked.shape[0]

    # Largest batch block that divides B but keeps >= 2 grid steps when
    # B >= 16, so a v7x megacore can split the "parallel" axis across cores.
    B_BLK = 8
    for cand in (128, 64, 32, 16, 8):
        if B % cand != 0:
            continue
        if B >= 16 and B // cand < 2:
            continue
        B_BLK = cand
        break
    grid = (B // B_BLK,)

    def nbytes(shape, dtype):
        return math.prod(shape) * jnp.dtype(dtype).itemsize

    blk_bytes = (nbytes((T, B_BLK, D), q_tbd.dtype)
                 + nbytes(w_ihT.shape, w_ihT.dtype)
                 + nbytes(w_hhT.shape, w_hhT.dtype)
                 + nbytes(b_lstm.shape, b_lstm.dtype)
                 + nbytes(wlwT.shape, wlwT.dtype)
                 + nbytes(wlb.shape, wlb.dtype)
                 + nbytes((B_BLK, Np), mem0.dtype)
                 + nbytes(adj_stacked.shape, adj_stacked.dtype)
                 + nbytes((B_BLK, Np), jnp.float32))
    # double-buffered blocks + compiler scratch headroom; 48 MiB cap is safe
    # on every generation (v7x has only 64 MiB physical VMEM).
    vmem_limit = int(min(max(4 * blk_bytes, 16 * 2 ** 20), 48 * 2 ** 20))

    flops = int(grid[0] * T * (2 * B_BLK * RNp * Np
                               + 2 * 2 * B_BLK * D * 4 * D
                               + 2 * B_BLK * D * R))
    transcendentals = int(grid[0] * T * B_BLK * (5 * D + T + R + 4))
    bytes_accessed = int(q_tbd.size * jnp.dtype(q_tbd.dtype).itemsize
                         + w_ihT.size * 2 + w_hhT.size * 2
                         + b_lstm.size * 4 + wlwT.size * 4 + wlb.size * 4
                         + mem0.size * 4 + adj_stacked.size * 2 + B * Np * 4)

    # TODO(synk): grid-invariant operands (adj_stacked, weights) could be
    # single-buffered (pipeline_mode=pl.Buffered(1)) or HBM-streamed in K
    # tiles for large Np; double-buffering them is negligible at these sizes.
    return pl.pallas_call(
        neurallp_kernel,
        out_shape=jax.ShapeDtypeStruct((B, Np), jnp.float32),
        grid_spec=pltpu.PrefetchScalarGridSpec(
            num_scalar_prefetch=0,
            grid=grid,
            in_specs=[
                pl.BlockSpec((T, B_BLK, D), lambda i: (0, i, 0)),
                pl.BlockSpec((D, 4 * D), lambda i: (0, 0)),
                pl.BlockSpec((D, 4 * D), lambda i: (0, 0)),
                pl.BlockSpec((1, 4 * D), lambda i: (0, 0)),
                pl.BlockSpec((D, R), lambda i: (0, 0)),
                pl.BlockSpec((1, R), lambda i: (0, 0)),
                pl.BlockSpec((B_BLK, Np), lambda i: (i, 0)),
                pl.BlockSpec((RNp, Np), lambda i: (0, 0)),
            ],
            out_specs=pl.BlockSpec((B_BLK, Np), lambda i: (i, 0)),
        ),
        compiler_params=pltpu.CompilerParams(
            dimension_semantics=("parallel",),
            vmem_limit_bytes=vmem_limit,
        ),
        cost_estimate=pl.CostEstimate(
            flops=flops, transcendentals=transcendentals,
            bytes_accessed=bytes_accessed),
    )(q_tbd, w_ihT, w_hhT, b_lstm, wlwT, wlb, mem0, adj_stacked)


def neural_lp_forward(params, data, batch, num_relation_half, num_step):
    """Mirrors NeuralLogicProgramming.forward (PyTorch)."""
    h_index = batch[..., 0]
    t_index = batch[..., 1]
    r_index = batch[..., 2]

    # negative_sample_to_tail
    is_t_neg = jnp.all(h_index == h_index[:, :1], axis=-1, keepdims=True)
    new_h = jnp.where(is_t_neg, h_index, t_index)
    new_t = jnp.where(is_t_neg, t_index, h_index)
    new_r = jnp.where(is_t_neg, r_index, r_index + num_relation_half)

    # unique (h, r) queries -- static size so the whole forward is traceable.
    # Pad to a multiple of 16 (>= 32) so the bf16 matmul LHS packs full
    # sublanes and the batch grid gets >= 2 steps (v7x megacore).
    hr_index = new_h * num_relation_half + new_r
    n_trip = int(hr_index.size)
    U = max(32, ((n_trip + 15) // 16) * 16)
    hr_set, hr_inverse = jnp.unique(hr_index.reshape(-1), return_inverse=True,
                                    size=U, fill_value=0)
    hr_inverse = hr_inverse.reshape(hr_index.shape)
    h_set = hr_set // num_relation_half
    r_set = hr_set % num_relation_half

    T = num_step
    Np = data["num_nodes"] + 1
    Np_pad = ((Np + 127) // 128) * 128                # lane-dense node dim
    R = num_relation_half * 2
    D = params["query_emb"].shape[1]

    # query sequence: (num_step - 1) copies of r, then the END relation
    end_index = jnp.full_like(r_set, num_relation_half)
    q_index = jnp.stack([r_set] * (T - 1) + [end_index], axis=0)   # (T, B)
    query = params["query_emb"][q_index].astype(jnp.bfloat16)      # (T, B, D)

    # initial memory: one-hot of heads, (B, Np_pad); padded nodes stay zero
    mem0 = jax.nn.one_hot(h_set, Np_pad, dtype=jnp.float32)

    # relational adjacency, built directly in the stacked layout the kernel
    # consumes: adj_stacked[r*Np + in, out] = #edges(in -r-> out).
    # f32 scatter-add is exact; bf16 cast is exact for multiplicities <= 256.
    node_in = data["edge_index"][0]
    node_out = data["edge_index"][1]
    rel = data["edge_type"]
    adj_stacked = jnp.zeros((R * Np_pad, Np_pad), jnp.float32).at[
        rel * Np_pad + node_in, node_out].add(1.0).astype(jnp.bfloat16)

    w_ihT = params["lstm_w_ih"].T.astype(jnp.bfloat16)             # (D, 4D)
    w_hhT = params["lstm_w_hh"].T.astype(jnp.bfloat16)             # (D, 4D)
    b_lstm = (params["lstm_b_ih"] + params["lstm_b_hh"])[None, :]  # (1, 4D)
    wlwT = params["wl_w"].T                                        # (D, R)
    wlb = params["wl_b"][None, :]                                  # (1, R)

    output = run_neurallp_kernel(
        query, w_ihT, w_hhT, b_lstm, wlwT, wlb, mem0, adj_stacked)  # (B, Np_pad)

    score = output[hr_inverse, new_t]                              # (bs, num_neg+1)
    score = score * params["lin_w"][0, 0] + params["lin_b"][0]     # Linear(1, 1)
    return score


def init_params(key, num_relation_half, hidden_dim):
    D = hidden_dim
    R = num_relation_half * 2
    ks = jax.random.split(key, 8)
    return {
        "query_emb": jax.random.normal(ks[0], (R + 1, D), jnp.float32) * 0.1,
        "lstm_w_ih": jax.random.normal(ks[1], (4 * D, D), jnp.float32) * 0.1,
        "lstm_w_hh": jax.random.normal(ks[2], (4 * D, D), jnp.float32) * 0.1,
        "lstm_b_ih": jax.random.normal(ks[3], (4 * D,), jnp.float32) * 0.1,
        "lstm_b_hh": jax.random.normal(ks[4], (4 * D,), jnp.float32) * 0.1,
        "wl_w": jax.random.normal(ks[5], (R, D), jnp.float32) * 0.1,
        "wl_b": jax.random.normal(ks[6], (R,), jnp.float32) * 0.1,
        "lin_w": jax.random.normal(ks[7], (1, 1), jnp.float32),
        "lin_b": jnp.zeros((1,), jnp.float32),
    }


if __name__ == "__main__":
    NUM_RELATION_ARG = 6           # module halves this: num_relation = 3
    num_relation_half = NUM_RELATION_ARG // 2
    hidden_dim = 32
    num_step = 3
    num_nodes = 31
    num_edges = 64

    root = jax.random.PRNGKey(0)
    k_param, k_ei, k_eo, k_et = jax.random.split(root, 4)
    params = init_params(k_param, num_relation_half, hidden_dim)

    data = {
        "num_nodes": num_nodes,
        "edge_index": jnp.stack([
            jax.random.randint(k_ei, (num_edges,), 0, num_nodes, jnp.int32),
            jax.random.randint(k_eo, (num_edges,), 0, num_nodes, jnp.int32),
        ], axis=0),
        "edge_type": jax.random.randint(
            k_et, (num_edges,), 0, num_relation_half * 2, jnp.int32),
    }

    # batch of triplets: (batch_size=2, num_negative+1=4, 3) -> (h, t, r)
    batch = jnp.array(
        [
            # row 0: tail negatives (all heads equal)
            [[5, 10, 1], [5, 12, 1], [5, 3, 1], [5, 20, 1]],
            # row 1: head negatives (heads differ) -> swapped inside the model
            [[3, 2, 1], [7, 4, 1], [9, 6, 1], [11, 8, 1]],
        ],
        dtype=jnp.int32,
    )

    score = neural_lp_forward(params, data, batch, num_relation_half, num_step)
    jax.block_until_ready(score)
    assert score.shape == batch.shape[:-1]
    assert bool(jnp.all(jnp.isfinite(score)))
    print("KERNEL_OK")
</pallas_src>

<mosaic_0001>
module attributes {stable_mosaic.version = 11 : i64} {
  func.func @neurallp_kernel(%arg0: i32, %arg1: memref<3x16x32xbf16, #tpu.memory_space<vmem>>, %arg2: memref<32x128xbf16, #tpu.memory_space<vmem>>, %arg3: memref<32x128xbf16, #tpu.memory_space<vmem>>, %arg4: memref<1x128xf32, #tpu.memory_space<vmem>>, %arg5: memref<32x6xf32, #tpu.memory_space<vmem>>, %arg6: memref<1x6xf32, #tpu.memory_space<vmem>>, %arg7: memref<16x128xf32, #tpu.memory_space<vmem>>, %arg8: memref<768x128xbf16, #tpu.memory_space<vmem>>, %arg9: memref<16x128xf32, #tpu.memory_space<vmem>>) attributes {dimension_semantics = [#tpu.dimension_semantics<parallel>], iteration_bounds = array<i64: 2>, scalar_prefetch = 0 : i64, scratch_operands = 0 : i64, tpu.core_type = #tpu.core_type<tc>, window_params = [{transform_indices = @transform_0, window_bounds = array<i64: 3, 16, 32>}, {pipeline_mode = #tpu.pipeline_mode<synchronous>, transform_indices = @transform_1, window_bounds = array<i64: 32, 128>}, {pipeline_mode = #tpu.pipeline_mode<synchronous>, transform_indices = @transform_2, window_bounds = array<i64: 32, 128>}, {pipeline_mode = #tpu.pipeline_mode<synchronous>, transform_indices = @transform_3, window_bounds = array<i64: 1, 128>}, {pipeline_mode = #tpu.pipeline_mode<synchronous>, transform_indices = @transform_4, window_bounds = array<i64: 32, 6>}, {pipeline_mode = #tpu.pipeline_mode<synchronous>, transform_indices = @transform_5, window_bounds = array<i64: 1, 6>}, {transform_indices = @transform_6, window_bounds = array<i64: 16, 128>}, {pipeline_mode = #tpu.pipeline_mode<synchronous>, transform_indices = @transform_7, window_bounds = array<i64: 768, 128>}, {transform_indices = @transform_8, window_bounds = array<i64: 16, 128>}]} {
    %c0 = arith.constant 0 : index
    %c0_0 = arith.constant 0 : index
    %0 = vector.load %arg2[%c0, %c0_0] : memref<32x128xbf16, #tpu.memory_space<vmem>>, vector<32x128xbf16>
    %c0_1 = arith.constant 0 : index
    %c0_2 = arith.constant 0 : index
    %1 = vector.load %arg3[%c0_1, %c0_2] : memref<32x128xbf16, #tpu.memory_space<vmem>>, vector<32x128xbf16>
    %c0_3 = arith.constant 0 : index
    %c0_4 = arith.constant 0 : index
    %2 = vector.load %arg4[%c0_3, %c0_4] : memref<1x128xf32, #tpu.memory_space<vmem>>, vector<1x128xf32>
    %c0_5 = arith.constant 0 : index
    %c0_6 = arith.constant 0 : index
    %3 = vector.load %arg5[%c0_5, %c0_6] : memref<32x6xf32, #tpu.memory_space<vmem>>, vector<32x6xf32>
    %c0_7 = arith.constant 0 : index
    %c0_8 = arith.constant 0 : index
    %4 = vector.load %arg6[%c0_7, %c0_8] : memref<1x6xf32, #tpu.memory_space<vmem>>, vector<1x6xf32>
    %c0_9 = arith.constant 0 : index
    %c0_10 = arith.constant 0 : index
    %5 = vector.load %arg8[%c0_9, %c0_10] : memref<768x128xbf16, #tpu.memory_space<vmem>>, vector<768x128xbf16>
    %cst = arith.constant 0.000000e+00 : f32
    %6 = vector.broadcast %cst : f32 to vector<16x32xf32>
    %cst_11 = arith.constant 0.000000e+00 : f32
    %7 = vector.broadcast %cst_11 : f32 to vector<16x32xf32>
    %c0_12 = arith.constant 0 : index
    %c0_13 = arith.constant 0 : index
    %c0_14 = arith.constant 0 : index
    %8 = vector.load %arg1[%c0_12, %c0_13, %c0_14] : memref<3x16x32xbf16, #tpu.memory_space<vmem>>, vector<1x16x32xbf16>
    %9 = vector.shape_cast %8 : vector<1x16x32xbf16> to vector<16x32xbf16>
    %cst_15 = arith.constant dense<0.000000e+00> : vector<16x128xf32>
    %10 = tpu.matmul %9, %0, %cst_15 {dimension_numbers = #tpu.dot_dimension_numbers<[1], [0], [0], [1], [0, 0, 1, 1], [], []>} : vector<16x32xbf16>, vector<32x128xbf16>, vector<16x128xf32> -> vector<16x128xf32>
    %11 = arith.truncf %6 : vector<16x32xf32> to vector<16x32xbf16>
    %cst_16 = arith.constant dense<0.000000e+00> : vector<16x128xf32>
    %12 = tpu.matmul %11, %1, %cst_16 {dimension_numbers = #tpu.dot_dimension_numbers<[1], [0], [0], [1], [0, 0, 1, 1], [], []>} : vector<16x32xbf16>, vector<32x128xbf16>, vector<16x128xf32> -> vector<16x128xf32>
    %13 = arith.addf %10, %12 : vector<16x128xf32>
    %14 = vector.broadcast %2 : vector<1x128xf32> to vector<16x128xf32>
    %15 = arith.addf %13, %14 : vector<16x128xf32>
    %16 = vector.extract_strided_slice %15 {offsets = [0, 0], sizes = [16, 32], strides = [1, 1]} : vector<16x128xf32> to vector<16x32xf32>
    %17 = arith.negf %16 : vector<16x32xf32>
    %18 = math.exp %17 : vector<16x32xf32>
    %cst_17 = arith.constant 1.000000e+00 : f32
    %19 = vector.broadcast %cst_17 : f32 to vector<16x32xf32>
    %20 = arith.addf %19, %18 : vector<16x32xf32>
    %21 = arith.divf %19, %20 : vector<16x32xf32>
    %22 = vector.extract_strided_slice %15 {offsets = [0, 32], sizes = [16, 32], strides = [1, 1]} : vector<16x128xf32> to vector<16x32xf32>
    %23 = arith.negf %22 : vector<16x32xf32>
    %24 = math.exp %23 : vector<16x32xf32>
    %cst_18 = arith.constant 1.000000e+00 : f32
    %25 = vector.broadcast %cst_18 : f32 to vector<16x32xf32>
    %26 = arith.addf %25, %24 : vector<16x32xf32>
    %27 = arith.divf %25, %26 : vector<16x32xf32>
    %28 = vector.extract_strided_slice %15 {offsets = [0, 64], sizes = [16, 32], strides = [1, 1]} : vector<16x128xf32> to vector<16x32xf32>
    %29 = math.tanh %28 : vector<16x32xf32>
    %30 = vector.extract_strided_slice %15 {offsets = [0, 96], sizes = [16, 32], strides = [1, 1]} : vector<16x128xf32> to vector<16x32xf32>
    %31 = arith.negf %30 : vector<16x32xf32>
    %32 = math.exp %31 : vector<16x32xf32>
    %cst_19 = arith.constant 1.000000e+00 : f32
    %33 = vector.broadcast %cst_19 : f32 to vector<16x32xf32>
    %34 = arith.addf %33, %32 : vector<16x32xf32>
    %35 = arith.divf %33, %34 : vector<16x32xf32>
    %36 = arith.mulf %27, %7 : vector<16x32xf32>
    %37 = arith.mulf %21, %29 : vector<16x32xf32>
    %38 = arith.addf %36, %37 : vector<16x32xf32>
    %39 = math.tanh %38 : vector<16x32xf32>
    %40 = arith.mulf %35, %39 : vector<16x32xf32>
    %c1 = arith.constant 1 : index
    %c0_20 = arith.constant 0 : index
    %c0_21 = arith.constant 0 : index
    %41 = vector.load %arg1[%c1, %c0_20, %c0_21] : memref<3x16x32xbf16, #tpu.memory_space<vmem>>, vector<1x16x32xbf16>
    %42 = vector.shape_cast %41 : vector<1x16x32xbf16> to vector<16x32xbf16>
    %cst_22 = arith.constant dense<0.000000e+00> : vector<16x128xf32>
    %43 = tpu.matmul %42, %0, %cst_22 {dimension_numbers = #tpu.dot_dimension_numbers<[1], [0], [0], [1], [0, 0, 1, 1], [], []>} : vector<16x32xbf16>, vector<32x128xbf16>, vector<16x128xf32> -> vector<16x128xf32>
    %44 = arith.truncf %40 : vector<16x32xf32> to vector<16x32xbf16>
    %cst_23 = arith.constant dense<0.000000e+00> : vector<16x128xf32>
    %45 = tpu.matmul %44, %1, %cst_23 {dimension_numbers = #tpu.dot_dimension_numbers<[1], [0], [0], [1], [0, 0, 1, 1], [], []>} : vector<16x32xbf16>, vector<32x128xbf16>, vector<16x128xf32> -> vector<16x128xf32>
    %46 = arith.addf %43, %45 : vector<16x128xf32>
    %47 = vector.broadcast %2 : vector<1x128xf32> to vector<16x128xf32>
    %48 = arith.addf %46, %47 : vector<16x128xf32>
    %49 = vector.extract_strided_slice %48 {offsets = [0, 0], sizes = [16, 32], strides = [1, 1]} : vector<16x128xf32> to vector<16x32xf32>
    %50 = arith.negf %49 : vector<16x32xf32>
    %51 = math.exp %50 : vector<16x32xf32>
    %cst_24 = arith.constant 1.000000e+00 : f32
    %52 = vector.broadcast %cst_24 : f32 to vector<16x32xf32>
    %53 = arith.addf %52, %51 : vector<16x32xf32>
    %54 = arith.divf %52, %53 : vector<16x32xf32>
    %55 = vector.extract_strided_slice %48 {offsets = [0, 32], sizes = [16, 32], strides = [1, 1]} : vector<16x128xf32> to vector<16x32xf32>
    %56 = arith.negf %55 : vector<16x32xf32>
    %57 = math.exp %56 : vector<16x32xf32>
    %cst_25 = arith.constant 1.000000e+00 : f32
    %58 = vector.broadcast %cst_25 : f32 to vector<16x32xf32>
    %59 = arith.addf %58, %57 : vector<16x32xf32>
    %60 = arith.divf %58, %59 : vector<16x32xf32>
    %61 = vector.extract_strided_slice %48 {offsets = [0, 64], sizes = [16, 32], strides = [1, 1]} : vector<16x128xf32> to vector<16x32xf32>
    %62 = math.tanh %61 : vector<16x32xf32>
    %63 = vector.extract_strided_slice %48 {offsets = [0, 96], sizes = [16, 32], strides = [1, 1]} : vector<16x128xf32> to vector<16x32xf32>
    %64 = arith.negf %63 : vector<16x32xf32>
    %65 = math.exp %64 : vector<16x32xf32>
    %cst_26 = arith.constant 1.000000e+00 : f32
    %66 = vector.broadcast %cst_26 : f32 to vector<16x32xf32>
    %67 = arith.addf %66, %65 : vector<16x32xf32>
    %68 = arith.divf %66, %67 : vector<16x32xf32>
    %69 = arith.mulf %60, %38 : vector<16x32xf32>
    %70 = arith.mulf %54, %62 : vector<16x32xf32>
    %71 = arith.addf %69, %70 : vector<16x32xf32>
    %72 = math.tanh %71 : vector<16x32xf32>
    %73 = arith.mulf %68, %72 : vector<16x32xf32>
    %c2 = arith.constant 2 : index
    %c0_27 = arith.constant 0 : index
    %c0_28 = arith.constant 0 : index
    %74 = vector.load %arg1[%c2, %c0_27, %c0_28] : memref<3x16x32xbf16, #tpu.memory_space<vmem>>, vector<1x16x32xbf16>
    %75 = vector.shape_cast %74 : vector<1x16x32xbf16> to vector<16x32xbf16>
    %cst_29 = arith.constant dense<0.000000e+00> : vector<16x128xf32>
    %76 = tpu.matmul %75, %0, %cst_29 {dimension_numbers = #tpu.dot_dimension_numbers<[1], [0], [0], [1], [0, 0, 1, 1], [], []>} : vector<16x32xbf16>, vector<32x128xbf16>, vector<16x128xf32> -> vector<16x128xf32>
    %77 = arith.truncf %73 : vector<16x32xf32> to vector<16x32xbf16>
    %cst_30 = arith.constant dense<0.000000e+00> : vector<16x128xf32>
    %78 = tpu.matmul %77, %1, %cst_30 {dimension_numbers = #tpu.dot_dimension_numbers<[1], [0], [0], [1], [0, 0, 1, 1], [], []>} : vector<16x32xbf16>, vector<32x128xbf16>, vector<16x128xf32> -> vector<16x128xf32>
    %79 = arith.addf %76, %78 : vector<16x128xf32>
    %80 = vector.broadcast %2 : vector<1x128xf32> to vector<16x128xf32>
    %81 = arith.addf %79, %80 : vector<16x128xf32>
    %82 = vector.extract_strided_slice %81 {offsets = [0, 0], sizes = [16, 32], strides = [1, 1]} : vector<16x128xf32> to vector<16x32xf32>
    %83 = arith.negf %82 : vector<16x32xf32>
    %84 = math.exp %83 : vector<16x32xf32>
    %cst_31 = arith.constant 1.000000e+00 : f32
    %85 = vector.broadcast %cst_31 : f32 to vector<16x32xf32>
    %86 = arith.addf %85, %84 : vector<16x32xf32>
    %87 = arith.divf %85, %86 : vector<16x32xf32>
    %88 = vector.extract_strided_slice %81 {offsets = [0, 32], sizes = [16, 32], strides = [1, 1]} : vector<16x128xf32> to vector<16x32xf32>
    %89 = arith.negf %88 : vector<16x32xf32>
    %90 = math.exp %89 : vector<16x32xf32>
    %cst_32 = arith.constant 1.000000e+00 : f32
    %91 = vector.broadcast %cst_32 : f32 to vector<16x32xf32>
    %92 = arith.addf %91, %90 : vector<16x32xf32>
    %93 = arith.divf %91, %92 : vector<16x32xf32>
    %94 = vector.extract_strided_slice %81 {offsets = [0, 64], sizes = [16, 32], strides = [1, 1]} : vector<16x128xf32> to vector<16x32xf32>
    %95 = math.tanh %94 : vector<16x32xf32>
    %96 = vector.extract_strided_slice %81 {offsets = [0, 96], sizes = [16, 32], strides = [1, 1]} : vector<16x128xf32> to vector<16x32xf32>
    %97 = arith.negf %96 : vector<16x32xf32>
    %98 = math.exp %97 : vector<16x32xf32>
    %cst_33 = arith.constant 1.000000e+00 : f32
    %99 = vector.broadcast %cst_33 : f32 to vector<16x32xf32>
    %100 = arith.addf %99, %98 : vector<16x32xf32>
    %101 = arith.divf %99, %100 : vector<16x32xf32>
    %102 = arith.mulf %93, %71 : vector<16x32xf32>
    %103 = arith.mulf %87, %95 : vector<16x32xf32>
    %104 = arith.addf %102, %103 : vector<16x32xf32>
    %105 = math.tanh %104 : vector<16x32xf32>
    %106 = arith.mulf %101, %105 : vector<16x32xf32>
    %c0_34 = arith.constant 0 : index
    %c0_35 = arith.constant 0 : index
    %107 = vector.load %arg7[%c0_34, %c0_35] : memref<16x128xf32, #tpu.memory_space<vmem>>, vector<16x128xf32>
    %108 = arith.mulf %40, %40 : vector<16x32xf32>
    %cst_36 = arith.constant dense<0.000000e+00> : vector<16xf32>
    %109 = vector.multi_reduction <add>, %108, %cst_36 [1] : vector<16x32xf32> to vector<16xf32>
    %110 = vector.shape_cast %109 : vector<16xf32> to vector<16x1xf32>
    %cst_37 = arith.constant dense<0xFF800000> : vector<16xf32>
    %111 = vector.multi_reduction <maximumf>, %110, %cst_37 [1] : vector<16x1xf32> to vector<16xf32>
    %112 = vector.shape_cast %111 : vector<16xf32> to vector<16x1xf32>
    %113 = arith.subf %110, %112 : vector<16x1xf32>
    %114 = math.exp %113 : vector<16x1xf32>
    %cst_38 = arith.constant dense<0.000000e+00> : vector<16xf32>
    %115 = vector.multi_reduction <add>, %114, %cst_38 [1] : vector<16x1xf32> to vector<16xf32>
    %116 = vector.shape_cast %115 : vector<16xf32> to vector<16x1xf32>
    %117 = tpu.reciprocal %116 {approx = true} : vector<16x1xf32> -> vector<16x1xf32>
    %118 = arith.mulf %114, %117 : vector<16x1xf32>
    %119 = vector.broadcast %118 : vector<16x1xf32> to vector<16x128xf32>
    %120 = arith.mulf %119, %107 : vector<16x128xf32>
    %cst_39 = arith.constant dense<0.000000e+00> : vector<16x6xf32>
    %121 = tpu.matmul %40, %3, %cst_39 {dimension_numbers = #tpu.dot_dimension_numbers<[1], [0], [0], [1], [0, 0, 1, 1], [], []>} : vector<16x32xf32>, vector<32x6xf32>, vector<16x6xf32> -> vector<16x6xf32>
    %122 = vector.broadcast %4 : vector<1x6xf32> to vector<16x6xf32>
    %123 = arith.addf %121, %122 : vector<16x6xf32>
    %cst_40 = arith.constant dense<0xFF800000> : vector<16xf32>
    %124 = vector.multi_reduction <maximumf>, %123, %cst_40 [1] : vector<16x6xf32> to vector<16xf32>
    %125 = vector.shape_cast %124 : vector<16xf32> to vector<16x1xf32>
    %126 = vector.broadcast %125 : vector<16x1xf32> to vector<16x6xf32>
    %127 = arith.subf %123, %126 : vector<16x6xf32>
    %128 = math.exp %127 : vector<16x6xf32>
    %cst_41 = arith.constant dense<0.000000e+00> : vector<16xf32>
    %129 = vector.multi_reduction <add>, %128, %cst_41 [1] : vector<16x6xf32> to vector<16xf32>
    %130 = vector.shape_cast %129 : vector<16xf32> to vector<16x1xf32>
    %131 = tpu.reciprocal %130 {approx = true} : vector<16x1xf32> -> vector<16x1xf32>
    %132 = vector.broadcast %131 : vector<16x1xf32> to vector<16x6xf32>
    %133 = arith.mulf %128, %132 : vector<16x6xf32>
    %134 = vector.extract_strided_slice %133 {offsets = [0, 0], sizes = [16, 1], strides = [1, 1]} : vector<16x6xf32> to vector<16x1xf32>
    %135 = vector.broadcast %134 : vector<16x1xf32> to vector<16x128xf32>
    %136 = arith.mulf %120, %135 : vector<16x128xf32>
    %137 = vector.extract_strided_slice %133 {offsets = [0, 1], sizes = [16, 1], strides = [1, 1]} : vector<16x6xf32> to vector<16x1xf32>
    %138 = vector.broadcast %137 : vector<16x1xf32> to vector<16x128xf32>
    %139 = arith.mulf %120, %138 : vector<16x128xf32>
    %140 = vector.extract_strided_slice %133 {offsets = [0, 2], sizes = [16, 1], strides = [1, 1]} : vector<16x6xf32> to vector<16x1xf32>
    %141 = vector.broadcast %140 : vector<16x1xf32> to vector<16x128xf32>
    %142 = arith.mulf %120, %141 : vector<16x128xf32>
    %143 = vector.extract_strided_slice %133 {offsets = [0, 3], sizes = [16, 1], strides = [1, 1]} : vector<16x6xf32> to vector<16x1xf32>
    %144 = vector.broadcast %143 : vector<16x1xf32> to vector<16x128xf32>
    %145 = arith.mulf %120, %144 : vector<16x128xf32>
    %146 = vector.extract_strided_slice %133 {offsets = [0, 4], sizes = [16, 1], strides = [1, 1]} : vector<16x6xf32> to vector<16x1xf32>
    %147 = vector.broadcast %146 : vector<16x1xf32> to vector<16x128xf32>
    %148 = arith.mulf %120, %147 : vector<16x128xf32>
    %149 = vector.extract_strided_slice %133 {offsets = [0, 5], sizes = [16, 1], strides = [1, 1]} : vector<16x6xf32> to vector<16x1xf32>
    %150 = vector.broadcast %149 : vector<16x1xf32> to vector<16x128xf32>
    %151 = arith.mulf %120, %150 : vector<16x128xf32>
    %152 = tpu.concatenate %136, %139, %142, %145, %148, %151 in 1 : vector<16x128xf32>, vector<16x128xf32>, vector<16x128xf32>, vector<16x128xf32>, vector<16x128xf32>, vector<16x128xf32> -> vector<16x768xf32>
    %153 = arith.truncf %152 : vector<16x768xf32> to vector<16x768xbf16>
    %cst_42 = arith.constant dense<0.000000e+00> : vector<16x128xf32>
    %154 = tpu.matmul %153, %5, %cst_42 {dimension_numbers = #tpu.dot_dimension_numbers<[1], [0], [0], [1], [0, 0, 1, 1], [], []>} : vector<16x768xbf16>, vector<768x128xbf16>, vector<16x128xf32> -> vector<16x128xf32>
    %cst_43 = arith.constant dense<0.000000e+00> : vector<16xf32>
    %155 = vector.multi_reduction <add>, %154, %cst_43 [1] : vector<16x128xf32> to vector<16xf32>
    %156 = vector.shape_cast %155 : vector<16xf32> to vector<16x1xf32>
    %cst_44 = arith.constant 1.000000e-10 : f32
    %157 = vector.broadcast %cst_44 : f32 to vector<16x1xf32>
    %158 = arith.maximumf %156, %157 : vector<16x1xf32>
    %159 = vector.broadcast %158 : vector<16x1xf32> to vector<16x128xf32>
    %160 = arith.divf %154, %159 : vector<16x128xf32>
    %161 = arith.mulf %40, %73 : vector<16x32xf32>
    %cst_45 = arith.constant dense<0.000000e+00> : vector<16xf32>
    %162 = vector.multi_reduction <add>, %161, %cst_45 [1] : vector<16x32xf32> to vector<16xf32>
    %163 = vector.shape_cast %162 : vector<16xf32> to vector<16x1xf32>
    %164 = arith.mulf %73, %73 : vector<16x32xf32>
    %cst_46 = arith.constant dense<0.000000e+00> : vector<16xf32>
    %165 = vector.multi_reduction <add>, %164, %cst_46 [1] : vector<16x32xf32> to vector<16xf32>
    %166 = vector.shape_cast %165 : vector<16xf32> to vector<16x1xf32>
    %167 = tpu.concatenate %163, %166 in 1 : vector<16x1xf32>, vector<16x1xf32> -> vector<16x2xf32>
    %cst_47 = arith.constant dense<0xFF800000> : vector<16xf32>
    %168 = vector.multi_reduction <maximumf>, %167, %cst_47 [1] : vector<16x2xf32> to vector<16xf32>
    %169 = vector.shape_cast %168 : vector<16xf32> to vector<16x1xf32>
    %170 = vector.broadcast %169 : vector<16x1xf32> to vector<16x2xf32>
    %171 = arith.subf %167, %170 : vector<16x2xf32>
    %172 = math.exp %171 : vector<16x2xf32>
    %cst_48 = arith.constant dense<0.000000e+00> : vector<16xf32>
    %173 = vector.multi_reduction <add>, %172, %cst_48 [1] : vector<16x2xf32> to vector<16xf32>
    %174 = vector.shape_cast %173 : vector<16xf32> to vector<16x1xf32>
    %175 = tpu.reciprocal %174 {approx = true} : vector<16x1xf32> -> vector<16x1xf32>
    %176 = vector.broadcast %175 : vector<16x1xf32> to vector<16x2xf32>
    %177 = arith.mulf %172, %176 : vector<16x2xf32>
    %178 = vector.extract_strided_slice %177 {offsets = [0, 0], sizes = [16, 1], strides = [1, 1]} : vector<16x2xf32> to vector<16x1xf32>
    %179 = vector.broadcast %178 : vector<16x1xf32> to vector<16x128xf32>
    %180 = arith.mulf %179, %107 : vector<16x128xf32>
    %181 = vector.extract_strided_slice %177 {offsets = [0, 1], sizes = [16, 1], strides = [1, 1]} : vector<16x2xf32> to vector<16x1xf32>
    %182 = vector.broadcast %181 : vector<16x1xf32> to vector<16x128xf32>
    %183 = arith.mulf %182, %160 : vector<16x128xf32>
    %184 = arith.addf %180, %183 : vector<16x128xf32>
    %cst_49 = arith.constant dense<0.000000e+00> : vector<16x6xf32>
    %185 = tpu.matmul %73, %3, %cst_49 {dimension_numbers = #tpu.dot_dimension_numbers<[1], [0], [0], [1], [0, 0, 1, 1], [], []>} : vector<16x32xf32>, vector<32x6xf32>, vector<16x6xf32> -> vector<16x6xf32>
    %186 = vector.broadcast %4 : vector<1x6xf32> to vector<16x6xf32>
    %187 = arith.addf %185, %186 : vector<16x6xf32>
    %cst_50 = arith.constant dense<0xFF800000> : vector<16xf32>
    %188 = vector.multi_reduction <maximumf>, %187, %cst_50 [1] : vector<16x6xf32> to vector<16xf32>
    %189 = vector.shape_cast %188 : vector<16xf32> to vector<16x1xf32>
    %190 = vector.broadcast %189 : vector<16x1xf32> to vector<16x6xf32>
    %191 = arith.subf %187, %190 : vector<16x6xf32>
    %192 = math.exp %191 : vector<16x6xf32>
    %cst_51 = arith.constant dense<0.000000e+00> : vector<16xf32>
    %193 = vector.multi_reduction <add>, %192, %cst_51 [1] : vector<16x6xf32> to vector<16xf32>
    %194 = vector.shape_cast %193 : vector<16xf32> to vector<16x1xf32>
    %195 = tpu.reciprocal %194 {approx = true} : vector<16x1xf32> -> vector<16x1xf32>
    %196 = vector.broadcast %195 : vector<16x1xf32> to vector<16x6xf32>
    %197 = arith.mulf %192, %196 : vector<16x6xf32>
    %198 = vector.extract_strided_slice %197 {offsets = [0, 0], sizes = [16, 1], strides = [1, 1]} : vector<16x6xf32> to vector<16x1xf32>
    %199 = vector.broadcast %198 : vector<16x1xf32> to vector<16x128xf32>
    %200 = arith.mulf %184, %199 : vector<16x128xf32>
    %201 = vector.extract_strided_slice %197 {offsets = [0, 1], sizes = [16, 1], strides = [1, 1]} : vector<16x6xf32> to vector<16x1xf32>
    %202 = vector.broadcast %201 : vector<16x1xf32> to vector<16x128xf32>
    %203 = arith.mulf %184, %202 : vector<16x128xf32>
    %204 = vector.extract_strided_slice %197 {offsets = [0, 2], sizes = [16, 1], strides = [1, 1]} : vector<16x6xf32> to vector<16x1xf32>
    %205 = vector.broadcast %204 : vector<16x1xf32> to vector<16x128xf32>
    %206 = arith.mulf %184, %205 : vector<16x128xf32>
    %207 = vector.extract_strided_slice %197 {offsets = [0, 3], sizes = [16, 1], strides = [1, 1]} : vector<16x6xf32> to vector<16x1xf32>
    %208 = vector.broadcast %207 : vector<16x1xf32> to vector<16x128xf32>
    %209 = arith.mulf %184, %208 : vector<16x128xf32>
    %210 = vector.extract_strided_slice %197 {offsets = [0, 4], sizes = [16, 1], strides = [1, 1]} : vector<16x6xf32> to vector<16x1xf32>
    %211 = vector.broadcast %210 : vector<16x1xf32> to vector<16x128xf32>
    %212 = arith.mulf %184, %211 : vector<16x128xf32>
    %213 = vector.extract_strided_slice %197 {offsets = [0, 5], sizes = [16, 1], strides = [1, 1]} : vector<16x6xf32> to vector<16x1xf32>
    %214 = vector.broadcast %213 : vector<16x1xf32> to vector<16x128xf32>
    %215 = arith.mulf %184, %214 : vector<16x128xf32>
    %216 = tpu.concatenate %200, %203, %206, %209, %212, %215 in 1 : vector<16x128xf32>, vector<16x128xf32>, vector<16x128xf32>, vector<16x128xf32>, vector<16x128xf32>, vector<16x128xf32> -> vector<16x768xf32>
    %217 = arith.truncf %216 : vector<16x768xf32> to vector<16x768xbf16>
    %cst_52 = arith.constant dense<0.000000e+00> : vector<16x128xf32>
    %218 = tpu.matmul %217, %5, %cst_52 {dimension_numbers = #tpu.dot_dimension_numbers<[1], [0], [0], [1], [0, 0, 1, 1], [], []>} : vector<16x768xbf16>, vector<768x128xbf16>, vector<16x128xf32> -> vector<16x128xf32>
    %cst_53 = arith.constant dense<0.000000e+00> : vector<16xf32>
    %219 = vector.multi_reduction <add>, %218, %cst_53 [1] : vector<16x128xf32> to vector<16xf32>
    %220 = vector.shape_cast %219 : vector<16xf32> to vector<16x1xf32>
    %cst_54 = arith.constant 1.000000e-10 : f32
    %221 = vector.broadcast %cst_54 : f32 to vector<16x1xf32>
    %222 = arith.maximumf %220, %221 : vector<16x1xf32>
    %223 = vector.broadcast %222 : vector<16x1xf32> to vector<16x128xf32>
    %224 = arith.divf %218, %223 : vector<16x128xf32>
    %225 = arith.mulf %40, %106 : vector<16x32xf32>
    %cst_55 = arith.constant dense<0.000000e+00> : vector<16xf32>
    %226 = vector.multi_reduction <add>, %225, %cst_55 [1] : vector<16x32xf32> to vector<16xf32>
    %227 = vector.shape_cast %226 : vector<16xf32> to vector<16x1xf32>
    %228 = arith.mulf %73, %106 : vector<16x32xf32>
    %cst_56 = arith.constant dense<0.000000e+00> : vector<16xf32>
    %229 = vector.multi_reduction <add>, %228, %cst_56 [1] : vector<16x32xf32> to vector<16xf32>
    %230 = vector.shape_cast %229 : vector<16xf32> to vector<16x1xf32>
    %231 = arith.mulf %106, %106 : vector<16x32xf32>
    %cst_57 = arith.constant dense<0.000000e+00> : vector<16xf32>
    %232 = vector.multi_reduction <add>, %231, %cst_57 [1] : vector<16x32xf32> to vector<16xf32>
    %233 = vector.shape_cast %232 : vector<16xf32> to vector<16x1xf32>
    %234 = tpu.concatenate %227, %230, %233 in 1 : vector<16x1xf32>, vector<16x1xf32>, vector<16x1xf32> -> vector<16x3xf32>
    %cst_58 = arith.constant dense<0xFF800000> : vector<16xf32>
    %235 = vector.multi_reduction <maximumf>, %234, %cst_58 [1] : vector<16x3xf32> to vector<16xf32>
    %236 = vector.shape_cast %235 : vector<16xf32> to vector<16x1xf32>
    %237 = vector.broadcast %236 : vector<16x1xf32> to vector<16x3xf32>
    %238 = arith.subf %234, %237 : vector<16x3xf32>
    %239 = math.exp %238 : vector<16x3xf32>
    %cst_59 = arith.constant dense<0.000000e+00> : vector<16xf32>
    %240 = vector.multi_reduction <add>, %239, %cst_59 [1] : vector<16x3xf32> to vector<16xf32>
    %241 = vector.shape_cast %240 : vector<16xf32> to vector<16x1xf32>
    %242 = tpu.reciprocal %241 {approx = true} : vector<16x1xf32> -> vector<16x1xf32>
    %243 = vector.broadcast %242 : vector<16x1xf32> to vector<16x3xf32>
    %244 = arith.mulf %239, %243 : vector<16x3xf32>
    %245 = vector.extract_strided_slice %244 {offsets = [0, 0], sizes = [16, 1], strides = [1, 1]} : vector<16x3xf32> to vector<16x1xf32>
    %246 = vector.broadcast %245 : vector<16x1xf32> to vector<16x128xf32>
    %247 = arith.mulf %246, %107 : vector<16x128xf32>
    %248 = vector.extract_strided_slice %244 {offsets = [0, 1], sizes = [16, 1], strides = [1, 1]} : vector<16x3xf32> to vector<16x1xf32>
    %249 = vector.broadcast %248 : vector<16x1xf32> to vector<16x128xf32>
    %250 = arith.mulf %249, %160 : vector<16x128xf32>
    %251 = arith.addf %247, %250 : vector<16x128xf32>
    %252 = vector.extract_strided_slice %244 {offsets = [0, 2], sizes = [16, 1], strides = [1, 1]} : vector<16x3xf32> to vector<16x1xf32>
    %253 = vector.broadcast %252 : vector<16x1xf32> to vector<16x128xf32>
    %254 = arith.mulf %253, %224 : vector<16x128xf32>
    %255 = arith.addf %251, %254 : vector<16x128xf32>
    %cst_60 = arith.constant dense<0.000000e+00> : vector<16x6xf32>
    %256 = tpu.matmul %106, %3, %cst_60 {dimension_numbers = #tpu.dot_dimension_numbers<[1], [0], [0], [1], [0, 0, 1, 1], [], []>} : vector<16x32xf32>, vector<32x6xf32>, vector<16x6xf32> -> vector<16x6xf32>
    %257 = vector.broadcast %4 : vector<1x6xf32> to vector<16x6xf32>
    %258 = arith.addf %256, %257 : vector<16x6xf32>
    %cst_61 = arith.constant dense<0xFF800000> : vector<16xf32>
    %259 = vector.multi_reduction <maximumf>, %258, %cst_61 [1] : vector<16x6xf32> to vector<16xf32>
    %260 = vector.shape_cast %259 : vector<16xf32> to vector<16x1xf32>
    %261 = vector.broadcast %260 : vector<16x1xf32> to vector<16x6xf32>
    %262 = arith.subf %258, %261 : vector<16x6xf32>
    %263 = math.exp %262 : vector<16x6xf32>
    %cst_62 = arith.constant dense<0.000000e+00> : vector<16xf32>
    %264 = vector.multi_reduction <add>, %263, %cst_62 [1] : vector<16x6xf32> to vector<16xf32>
    %265 = vector.shape_cast %264 : vector<16xf32> to vector<16x1xf32>
    %266 = tpu.reciprocal %265 {approx = true} : vector<16x1xf32> -> vector<16x1xf32>
    %267 = vector.broadcast %266 : vector<16x1xf32> to vector<16x6xf32>
    %268 = arith.mulf %263, %267 : vector<16x6xf32>
    %269 = vector.extract_strided_slice %268 {offsets = [0, 0], sizes = [16, 1], strides = [1, 1]} : vector<16x6xf32> to vector<16x1xf32>
    %270 = vector.broadcast %269 : vector<16x1xf32> to vector<16x128xf32>
    %271 = arith.mulf %255, %270 : vector<16x128xf32>
    %272 = vector.extract_strided_slice %268 {offsets = [0, 1], sizes = [16, 1], strides = [1, 1]} : vector<16x6xf32> to vector<16x1xf32>
    %273 = vector.broadcast %272 : vector<16x1xf32> to vector<16x128xf32>
    %274 = arith.mulf %255, %273 : vector<16x128xf32>
    %275 = vector.extract_strided_slice %268 {offsets = [0, 2], sizes = [16, 1], strides = [1, 1]} : vector<16x6xf32> to vector<16x1xf32>
    %276 = vector.broadcast %275 : vector<16x1xf32> to vector<16x128xf32>
    %277 = arith.mulf %255, %276 : vector<16x128xf32>
    %278 = vector.extract_strided_slice %268 {offsets = [0, 3], sizes = [16, 1], strides = [1, 1]} : vector<16x6xf32> to vector<16x1xf32>
    %279 = vector.broadcast %278 : vector<16x1xf32> to vector<16x128xf32>
    %280 = arith.mulf %255, %279 : vector<16x128xf32>
    %281 = vector.extract_strided_slice %268 {offsets = [0, 4], sizes = [16, 1], strides = [1, 1]} : vector<16x6xf32> to vector<16x1xf32>
    %282 = vector.broadcast %281 : vector<16x1xf32> to vector<16x128xf32>
    %283 = arith.mulf %255, %282 : vector<16x128xf32>
    %284 = vector.extract_strided_slice %268 {offsets = [0, 5], sizes = [16, 1], strides = [1, 1]} : vector<16x6xf32> to vector<16x1xf32>
    %285 = vector.broadcast %284 : vector<16x1xf32> to vector<16x128xf32>
    %286 = arith.mulf %255, %285 : vector<16x128xf32>
    %287 = tpu.concatenate %271, %274, %277, %280, %283, %286 in 1 : vector<16x128xf32>, vector<16x128xf32>, vector<16x128xf32>, vector<16x128xf32>, vector<16x128xf32>, vector<16x128xf32> -> vector<16x768xf32>
    %288 = arith.truncf %287 : vector<16x768xf32> to vector<16x768xbf16>
    %cst_63 = arith.constant dense<0.000000e+00> : vector<16x128xf32>
    %289 = tpu.matmul %288, %5, %cst_63 {dimension_numbers = #tpu.dot_dimension_numbers<[1], [0], [0], [1], [0, 0, 1, 1], [], []>} : vector<16x768xbf16>, vector<768x128xbf16>, vector<16x128xf32> -> vector<16x128xf32>
    %cst_64 = arith.constant dense<0.000000e+00> : vector<16xf32>
    %290 = vector.multi_reduction <add>, %289, %cst_64 [1] : vector<16x128xf32> to vector<16xf32>
    %291 = vector.shape_cast %290 : vector<16xf32> to vector<16x1xf32>
    %cst_65 = arith.constant 1.000000e-10 : f32
    %292 = vector.broadcast %cst_65 : f32 to vector<16x1xf32>
    %293 = arith.maximumf %291, %292 : vector<16x1xf32>
    %294 = vector.broadcast %293 : vector<16x1xf32> to vector<16x128xf32>
    %295 = arith.divf %289, %294 : vector<16x128xf32>
    %c0_66 = arith.constant 0 : index
    %c0_67 = arith.constant 0 : index
    %296 = vector.load %arg9[%c0_66, %c0_67] : memref<16x128xf32, #tpu.memory_space<vmem>>, vector<16x128xf32>
    tpu.vector_store %arg9[%c0_66, %c0_67], %295 {strides = array<i32>} : memref<16x128xf32, #tpu.memory_space<vmem>>, vector<16x128xf32>,
    return
  }
  func.func @transform_0(%arg0: i32) -> (i32, i32, i32) {
    %c0_i32 = arith.constant 0 : i32
    %c0_i32_0 = arith.constant 0 : i32
    %c0_i32_1 = arith.constant 0 : i32
    return %c0_i32, %arg0, %c0_i32_0 : i32, i32, i32
  }
  func.func @transform_1(%arg0: i32) -> (i32, i32) {
    %c0_i32 = arith.constant 0 : i32
    %c0_i32_0 = arith.constant 0 : i32
    %c0_i32_1 = arith.constant 0 : i32
    return %c0_i32, %c0_i32_0 : i32, i32
  }
  func.func @transform_2(%arg0: i32) -> (i32, i32) {
    %c0_i32 = arith.constant 0 : i32
    %c0_i32_0 = arith.constant 0 : i32
    %c0_i32_1 = arith.constant 0 : i32
    return %c0_i32, %c0_i32_0 : i32, i32
  }
  func.func @transform_3(%arg0: i32) -> (i32, i32) {
    %c0_i32 = arith.constant 0 : i32
    %c0_i32_0 = arith.constant 0 : i32
    %c0_i32_1 = arith.constant 0 : i32
    return %c0_i32, %c0_i32_0 : i32, i32
  }
  func.func @transform_4(%arg0: i32) -> (i32, i32) {
    %c0_i32 = arith.constant 0 : i32
    %c0_i32_0 = arith.constant 0 : i32
    %c0_i32_1 = arith.constant 0 : i32
    return %c0_i32, %c0_i32_0 : i32, i32
  }
  func.func @transform_5(%arg0: i32) -> (i32, i32) {
    %c0_i32 = arith.constant 0 : i32
    %c0_i32_0 = arith.constant 0 : i32
    %c0_i32_1 = arith.constant 0 : i32
    return %c0_i32, %c0_i32_0 : i32, i32
  }
  func.func @transform_6(%arg0: i32) -> (i32, i32) {
    %c0_i32 = arith.constant 0 : i32
    %c0_i32_0 = arith.constant 0 : i32
    return %arg0, %c0_i32 : i32, i32
  }
  func.func @transform_7(%arg0: i32) -> (i32, i32) {
    %c0_i32 = arith.constant 0 : i32
    %c0_i32_0 = arith.constant 0 : i32
    %c0_i32_1 = arith.constant 0 : i32
    return %c0_i32, %c0_i32_0 : i32, i32
  }
  func.func @transform_8(%arg0: i32) -> (i32, i32) {
    %c0_i32 = arith.constant 0 : i32
    %c0_i32_0 = arith.constant 0 : i32
    return %arg0, %c0_i32 : i32, i32
  }
}

</mosaic_0001>

<bundles_post_ra>
// kernel: tpu_custom_call.1
= control target key start
LH: loop header
LB: loop body
LE: loop exit
PB: predicated region body
PF: predicated region fallthrough
CT: control target
= control target key end

     0   :  { %13 = vsyncpa [#allocation3], 0  ;;  %s4315_s0 = inlined_call_operand.hbm [shape: bf16[3,32,32], index: 0, kind: input, shape index: {}]   ;;  %s4316_s1 = inlined_call_operand.vmem [shape: bf16[32,128], index: 1, kind: input, shape index: {}]   ;;  %s4317_s2 = inlined_call_operand.hbm [shape: bf16[32,128], index: 2, kind: input, shape index: {}]   ;;  %s4318_s3 = inlined_call_operand.vmem [shape: f32[1,128], index: 3, kind: input, shape index: {}]   ;;  %s4319_s4 = inlined_call_operand.vmem [shape: f32[32,6], index: 4, kind: input, shape index: {}]   ;;  %s4320_s5 = inlined_call_operand.vmem [shape: f32[1,6], index: 5, kind: input, shape index: {}]   ;;  %s4321_s6 = inlined_call_operand.vmem [shape: f32[32,128], index: 6, kind: input, shape index: {}]   ;;  %s4322_s7 = inlined_call_operand.hbm [shape: bf16[768,128], index: 7, kind: input, shape index: {}]   ;;  %s4323_s8 = inlined_call_operand.hbm [shape: f32[32,128], index: 8, kind: output, shape index: {}]  }
   0x1   :  { %15 = vsyncpa [#allocation3 + $0x1], 0 }
   0x2   :  { %16 = vsyncpa [#allocation6], 0 }
   0x3   :  { %17 = vsyncpa [#allocation4], 0 }
   0x4   :  { %19 = vsyncpa [#allocation4 + $0x1], 0  ;;  %s3508_s27 = smov 0   ;;  %s3510_s28 = smov 0  }
   0x5   :  { %s3512_s29 = smov 0   ;;  %s3514_s30 = smov 0  }
   0x6 LB: > { %4353 = sst [smem:[#allocation15_spill]] %s3426_s27  ;;  %s3529_s9 = sadd.s32 4294967295, %s3438_s30   ;;  %s3438_s30 = sphi %s3514_s30, %s4394_s30   ;;  %s3434_s29 = sphi %s3512_s29, %s4398_s29   ;;  %s3430_s28 = sphi %s3510_s28, %s4397_s28   ;;  %s3426_s27 = sphi %s3508_s27, %s4396_s27  }
   0x7   : > { %s2553_s10 = sadd.s32 4294967294, %s3438_s30   ;;  %s3533_s11 = sadd.s32 1, %s3438_s30  }
   0x8   : > { %4354 = sst [smem:[#allocation16_spill]] %s3533_s11  ;;  %s32_s12 = sadd.s32 1, %s3434_s29 }
   0x9   : > { %s29_s13 = ssub.s32 %s3438_s30, %s3533_s11  ;;  %p39_p0 = scmp.ne.s32.totalorder %s3434_s29, %s3430_s28 }
   0xa   : > { %p30_p1 = scmp.eq.s32.totalorder %s29_s13, 0  ;;  %p40_p2 = scmp.eq.s32.totalorder %s3438_s30, 0 }
   0xb   : > { %p45_p3 = scmp.ne.s32.totalorder %s3430_s28, %s3426_s27  ;;  %p4324_p4 = scmp.eq.s32.totalorder %s3529_s9, 0 }
   0xc   : > { %s3545_s14 = scalar_select %p30_p1, %s3434_s29, %s32_s12  }
   0xd   : > { %p3547_p5 = por %p40_p2, %p39_p0  ;;  %p3553_p6 = por %p4324_p4, %p45_p3 }
   0xe   : > { %4355 = sst [smem:[#allocation17_spill]] %s3545_s14  ;;  %p221_p7 = scmp.eq.s32.totalorder %s3529_s9, 1 }
   0xf   : > { %s4356_s15 = scalar_select %p3547_p5, 1, 0 }
  0x10   : > { %s4357_s16 = scalar_select %p3553_p6, 1, 0 }
  0x11   : > { %p227_p8 = scmp.eq.s32.totalorder %s2553_s10, 1  ;;  %p2554_p9 = scmp.ge.s32.totalorder %s3438_s30, 1 }
  0x12   : > { %p234_p10 = scmp.lt.s32.totalorder %s3438_s30, 3  ;;  %p3560_p11 = por %p221_p7, %p39_p0 }
  0x13   : > { %p3564_p12 = por %p227_p8, %p45_p3  ;;  %s3440_s20 = smov [#allocation5]  }
  0x14   : > { %s4358_s17 = scalar_select %p3560_p11, 1, 0 }
  0x15   : > { %s4359_s18 = scalar_select %p3564_p12, 1, 0 }
  0x16   : > { %p3568_p13 = pnand %p2554_p9, %p234_p10  ;;  %s249_s21 = sshll.u32 %s3440_s20, 4  ;;  %s250_s21 = int_to_ptr.vmem [resolvable:$true] %s249_s21 }
  0x17   : > { %4360 = sst [smem:[#allocation18_spill]] %s4359_s18  ;;  %s3441_s23 = smov [#allocation7]  }
  0x18   : > { %s4361_s19 = scalar_select %p3568_p13, 1, 0 }
  0x19   : > { %p3013_p1 = pneg %p3568_p13  ;;  %s271_s24 = sshll.u32 %s3441_s23, 4  ;;  %s3580_s24 = int_to_ptr.vmem [resolvable:$true] %s271_s24 }
  0x1a   : > { %s3312_s10 = scalar_lea.hbm %s4317_s2, 256 }
  0x1b   : > { %p3576_p2 = pnand %p3013_p1, %p4324_p4  ;;  %p3313_p0 = scmp.ne.s32.totalorder %s4317_s2, %s3312_s10 }
  0x1c   : > { %p3319_p9 = scmp.lt.u32.totalorder %s3312_s10, %s4317_s2 }
  0x1d   : > { %p3314_p3 = pneg %p3576_p2 }
  0x1f   : > { %p3315_p7 = pnand %p3314_p3, %p3313_p0 }
  0x21   : > { %p3316_p8 = pneg %p3315_p7 }
  0x23   : > { %p3321_p10 = pnand %p3319_p9, %p3316_p8 }
  0x25   : > { %3324 = shalt.err (!%p3321_p10)
}
  0x26   : > { %s3325_s23 = scalar_lea.vmem %s250_s21, 256  ;;  %p3333_p11 = scmp.lt.s32.totalorder %s250_s21, %s250_s21 }
  0x27   : > { %p3326_p1 = scmp.ne.s32.totalorder %s250_s21, %s3325_s23  ;;  %p3334_p6 = scmp.lt.s32.totalorder %s3325_s23, %s3325_s23 }
  0x29   : > { %p3328_p4 = pnand %p3326_p1, %p3314_p3  ;;  %p3335_p13 = por %p3334_p6, %p3333_p11 }
  0x2b   : > { %p3329_p12 = pneg %p3328_p4 }
  0x2d   : > { %p3336_p5 = pnand %p3335_p13, %p3329_p12 }
  0x2f   : > { %3339 = shalt.err (!%p3336_p5)
}
  0x30   : > { %s3442_s25 = smov 64   ;;  %s3443_s26 = smov 4  }
  0x31   : > { %3016 = dma.hbm_to_vmem [thread:$0]  (!%p3576_p2), %s4317_s2, 256, %s250_s21, [#allocation6], %s3442_s25, %s3442_s25, %s3443_s26  }
  0x32   : > { %s3340_s20 = scalar_lea.hbm %s4322_s7, 6144 }
  0x33   : > { %p3341_p4 = scmp.ne.s32.totalorder %s4322_s7, %s3340_s20  ;;  %p3347_p11 = scmp.lt.u32.totalorder %s3340_s20, %s4322_s7 }
  0x35   : > { %p3343_p5 = pnand %p3341_p4, %p3314_p3 }
  0x37   : > { %p3344_p6 = pneg %p3343_p5 }
  0x39   : > { %p3349_p12 = pnand %p3347_p11, %p3344_p6 }
  0x3b   : > { %3352 = shalt.err (!%p3349_p12)
}
  0x3c   : > { %s3353_s21 = scalar_lea.vmem %s3580_s24, 6144  ;;  %p3361_p8 = scmp.lt.s32.totalorder %s3580_s24, %s3580_s24 }
  0x3d   : > { %p3354_p13 = scmp.ne.s32.totalorder %s3580_s24, %s3353_s21  ;;  %p3362_p9 = scmp.lt.s32.totalorder %s3353_s21, %s3353_s21 }
  0x3f   : > { %p3356_p0 = pnand %p3354_p13, %p3314_p3  ;;  %p3363_p10 = por %p3362_p9, %p3361_p8 }
  0x41   : > { %p3357_p7 = pneg %p3356_p0 }
  0x43   : > { %p3364_p1 = pnand %p3363_p10, %p3357_p7 }
  0x45   : > { %3367 = shalt.err (!%p3364_p1)
}
  0x46   : > { %3019 = dma.hbm_to_vmem [thread:$0]  (!%p3576_p2), %s4322_s7, 6144, %s3580_s24, [#allocation6], %s3442_s25, %s3442_s25, %s3443_s26  }
  0x47   : > { %p2557_p4 = scmp.ge.s32.totalorder %s3438_s30, 2 }
  0x49   : > { %281 = sbr.rel (%p2557_p4) target bundleno = 96 (0x60), region = 40 }
  0x50   : > { %s285_s18 = sand.u32 1, %s3434_s29   ;;  %s2651_s22 = sshll.u32 %s3438_s30, 7 }
  0x51   : > { %s2992_s14 = smul.u32 24, %s285_s18  ;;  %s3444_s10 = smov 256  }
  0x52   : > { %p4363_p3 = scmp.ne.s32.totalorder %s4356_s15, 0  ;;  %s295_s12 = scalar_lea.hbm %s4315_s0, %s2651_s22 }
  0x53   : > { %s289_s20 = scalar_lea.vmem [#allocation2], %s2992_s14  ;;  %s3445_s21 = smov 128  }
  0x54   : > { %2999 = sst [smem:[#allocation10]] (%p4363_p3), %s3444_s10  ;;  %s308_s23 = sshll.u32 %s289_s20, 4  ;;  %s309_s23 = int_to_ptr.vmem [resolvable:$true] %s308_s23 }
  0x55   : > { %s2998_s24 = scalar_select %p4363_p3, [#allocation0], [#allocation11] }
  0x56   : > { %3000 = sst [smem:[#allocation10 + $0x1]] (%p4363_p3), %s3445_s21  ;;  %s3446_s27 = smov 2  }
  0x57   : > { %s300_s13 = sld [smem:[%s2998_s24]]   ;;  %s3447_s11 = smov 64  }
  0x58   : > { %3001 = sst [smem:[#allocation10 + $0x2]] (%p4363_p3), %s3446_s27  ;;  %s3448_s10 = smov 4  }
  0x59   : > { %3002 = sst [smem:[#allocation10 + $0x3]] (%p4363_p3), %s3447_s11  ;;  %s286_s14 = scalar_lea.sflag [#allocation3], %s285_s18 }
  0x5a   : > { %3003 = sst [smem:[#allocation10 + $0x4]] (%p4363_p3), %s3447_s11  ;;  %s3449_s25 = smov [#allocation9]  }
  0x5b   : > { %3004 = sst [smem:[#allocation10 + $0x5]] (%p4363_p3), %s3448_s10 }
  0x5d   : > { %s2560_s22 = sshll.u32 %s300_s13, 26 }
  0x5e   : > { %s2561_s24 = sadd.s32 134217728, %s2560_s22 }
  0x5f   : > { %3005 = dma.general (%p4363_p3), %s295_s12, 384, %s309_s23, %s286_s14, %s3449_s25, [#allocation10], %s2561_s24, 0  }
  0x60 PF: > { %p4364_p2 = scmp.ne.s32.totalorder %s4361_s19, 0 }
  0x62   : > { %342 = sbr.rel (%p4364_p2) target bundleno = 4059 (0xfdb), region = 52 }
  0x69   : > { %s3656_s26 = sand.u32 1, %s3430_s28   ;;  %p4365_p5 = scmp.ne.s32.totalorder %s4357_s16, 0 }
  0x6a   : > { %s2993_s20 = smul.u32 24, %s3656_s26  ;;  %s345_s21 = scalar_lea.sflag [#allocation3], %s3656_s26 }
  0x6c   : > { %s3660_s27 = scalar_lea.vmem [#allocation2], %s2993_s20 }
  0x6d   : > { %3413 = dma.done.wait (%p4365_p5), %s345_s21, 384  }
  0x6e   : > { %3415 = vsyncadd (%p4365_p5), %s345_s21, 4294966912  ;;  %p4366_p6 = scmp.eq.s32.totalorder %s3529_s9, 0 }
  0x70   : > { %3417 = dma.done.wait (%p4366_p6), [#allocation6], 6400   ;;  %p4367_p11 = pmov %p4366_p6 }
  0x71   : > { %v3450_v0 = vmov 0.0   ;;  %vm3451_vm0 = vmmov 0   ;;  %v3676_v1 = vld [vmem:[#allocation5] sm:$0xff]   ;;  %v3678_v2 = vld [vmem:[#allocation5 + $0x8] sm:$0xff]   ;;  %v3684_v3 = vld [vmem:[%s4316_s1] sm:$0xff]   ;;  %vm527_vm1 = vcmask 261120  }
  0x72   : > { %3419 = vsyncadd (%p4367_p11), [#allocation6], 4294960896  ;;  %2887 = vmatprep.subr.bf16.mxu0 %v3450_v0  ;;  %2891 = vmatprep.mubr.msk.bf16.mxu0 %vm3451_vm0, %v3450_v0  ;;  %v3690_v4 = vld [vmem:[%s4316_s1 + $0x8] sm:$0xff]   ;;  %v4337_v5 = vmov 0   ;;  %v3123_v6 = vld [vmem:[%s3660_s27] sm:$0xff]   ;;  %s3453_s23 = smov 64  }
  0x73   : > { %2911 = vmatprep.subr.bf16.mxu1 %v3450_v0  ;;  %2915 = vmatprep.mubr.msk.bf16.mxu1 %vm3451_vm0, %v3450_v0  ;;  %v3716_v11 = vld [vmem:[%s4318_s3] ss:$0 sm:$0xff]  ;;  %s3454_s11 = smov 32   ;;  %vm1112_vm2 = vcmask 48128   ;;  %s2566_s19 = sshll.u32 %s3529_s9, 1  ;;  %vm1656_vm3 = vcmask 7168  }
  0x74   : > { %2888 = vmatpush3.bf16.msra.mxu0 %v3676_v1  ;;  %2912 = vmatpush3.bf16.msra.mxu1 %v3684_v3  ;;  %v3124_v40 = vld [vmem:[%s3660_s27 + $0x8] sm:$0xff]   ;;  %p396_p12 = scmp.lt.s32.totalorder %s2566_s19, 3  ;;  %vm1659_vm4 = vcmask 15360   ;;  %vm2066_vm5 = vcmask 23552   ;;  %s2565_s22 = sshll.u32 %s3656_s26, 4 }
  0x75   : > { %2889 = vmatprep.subr.bf16.mxu0 %v3450_v0  ;;  %2913 = vmatprep.subr.bf16.mxu1 %v3450_v0  ;;  %s2652_s24 = sshll.u32 %s3529_s9, 8  ;;  %s393_s14 = scalar_lea.vmem [#allocation8], %s2565_s22 }
  0x76   : > { %s4400_s19 = smov (!%p396_p12, %s2566_s19), 3  ;;  %s2449_s25 = sshll.u32 %s393_s14, 4  ;;  %s4271_s25 = int_to_ptr.vmem [resolvable:$true] %s2449_s25 }
  0x77   : > { %s2567_s18 = sshll.u32 %s4400_s19, 3  ;;  %s2436_s15 = scalar_lea.sflag [#allocation4], %s3656_s26 }
  0x78   : > { %2890 = vmatpush3.bf16.msra.mxu0 %v3678_v2  ;;  %2914 = vmatpush3.bf16.msra.mxu1 %v3690_v4  ;;  %s3974_s10 = scalar_lea.vmem %s4321_s6, %s2567_s18  ;;  %s3368_s9 = scalar_lea.vmem %s4271_s25, 256 }
  0x79   : > { %2895 = vmatprep.subr.bf16.mxu0 %v3450_v0  ;;  %2927 = vmatprep.subr.bf16.mxu1 %v3450_v0  ;;  %p3369_p13 = scmp.ne.s32.totalorder %s4271_s25, %s3368_s9  ;;  %p4390_p0 = scmp.ne.s32.totalorder %s4358_s17, 0 }
  0x7a   : > { %s3460_s16 = smov [#allocation8]  }
  0x7b   : > { %2892 = vmatmul.mubr.bf16.vlgmr.msra.gmra.mrb[0].mxu0 %v4337_v5  ;;  %2916 = vmatmul.mubr.msk.bf16.vlgmr.msra.gmra.mrb[0].mxu1 %vm527_vm1, %v3124_v40  ;;  %p3370_p7 = pnand %p3369_p13, %p4390_p0  ;;  %s3372_s19 = sshll.u32 %s3460_s16, 4  ;;  %s3373_s19 = int_to_ptr.vmem [resolvable:$false] %s3372_s19 }
  0x7c   : > { %2896 = vmatpush3.bf16.msra.mxu0 %v3684_v3  ;;  %2899 = vmatprep.mubr.msk.bf16.mxu0 %vm3451_vm0, %v3450_v0  ;;  %s3374_s18 = scalar_lea.vmem %s3373_s19, 512  ;;  %p3375_p9 = scmp.lt.s32.totalorder %s4271_s25, %s3373_s19 }
  0x7d   : > { %2897 = vmatprep.subr.bf16.mxu0 %v3450_v0  ;;  %2928 = vmatpush3.bf16.msra.mxu1 %v3684_v3  ;;  %p3371_p8 = pneg %p3370_p7  ;;  %p3376_p10 = scmp.lt.s32.totalorder %s3374_s18, %s3368_s9 }
  0x7e   : > { %2931 = vmatprep.mubr.msk.bf16.mxu1 %vm3451_vm0, %v3450_v0  ;;  %2929 = vmatprep.subr.bf16.mxu1 %v3450_v0 }
  0x7f   : > { %p3377_p1 = por %p3376_p10, %p3375_p9 }
  0x80   : > { %2898 = vmatpush3.bf16.msra.mxu0 %v3690_v4 }
  0x81   : > { %2903 = vmatprep.subr.bf16.mxu0 %v3450_v0  ;;  %2930 = vmatpush3.bf16.msra.mxu1 %v3690_v4  ;;  %p3378_p3 = pnand %p3377_p1, %p3371_p8 }
  0x83   : > { %2900 = vmatmul.mubr.msk.bf16.vlgmr.msra.gmra.mrb[4].mxu0 %vm527_vm1, %v3123_v6 }
  0x84   : > { %2904 = vmatpush3.bf16.msra.mxu0 %v3676_v1  ;;  %2907 = vmatprep.mubr.msk.bf16.mxu0 %vm3451_vm0, %v3450_v0 }
  0x85   : > { %2905 = vmatprep.subr.bf16.mxu0 %v3450_v0 }
  0x88   : > { %2906 = vmatpush3.bf16.msra.mxu0 %v3678_v2 }
  0x89   : > { %2919 = vmatprep.subr.bf16.mxu0 %v3450_v0 }
 0x14e   : > { %v565_v7 = vpop.f32.mrb[0].mxu0  ;;  %v782_v48 = vpop.f32.mrb[0].mxu1 }
 0x14f   : > { %v2893_v8 = vpop.f32.mrb[1].mxu0  ;;  %v2917_v49 = vpop.f32.mrb[1].mxu1 }
 0x150   : > { %v568_v9 = vpop.f32.mrb[2].mxu0  ;;  %v785_v51 = vpop.f32.mrb[2].mxu1 }
 0x151   : > { %v2894_v10 = vpop.f32.mrb[3].mxu0  ;;  %v2918_v52 = vpop.f32.mrb[3].mxu1 }
 0x156   : > { %v626_v12 = vpop.f32.mrb[4].mxu0 }
 0x157   : > { %v627_v13 = vadd.f32 %v626_v12, %v565_v7  ;;  %v2901_v14 = vpop.f32.mrb[5].mxu0 }
 0x158   : > { %v629_v15 = vpop.f32.mrb[6].mxu0 }
 0x159   : > { %v639_v16 = vadd.f32 %v3716_v11, %v627_v13  ;;  %v630_v17 = vadd.f32 %v629_v15, %v568_v9  ;;  %v2902_v18 = vpop.f32.mrb[7].mxu0 }
 0x15b   : > { %3174 = vtanh.f32 %v639_v16  ;;  %v640_v19 = vadd.f32 %v3716_v11, %v630_v17  ;;  %v2575_v22 = vmul.f32 -1.442695, %v639_v16 }
 0x15d   : > { %3176 = vtanh.f32 %v640_v19  ;;  %v2576_v23 = vmul.f32 -1.442695, %v640_v19 }
 0x15e   : > { %3178 = vpow2.f32 %v2575_v22  ;;  %v413_v22 = vld [vmem:[%s4319_s4 + $0x8] sm:$0xff] }
 0x15f   : > { %3180 = vpow2.f32 %v2576_v23  ;;  %v3125_v23 = vld [vmem:[%s3660_s27 + $0x10] sm:$0xff]   ;;  %s4269_s27 = scalar_lea.hbm %s4323_s8, %s2652_s24 }
 0x160   : > { %2932 = vmatmul.mubr.msk.bf16.vlgmr.msra.gmra.mrb[4].mxu1 %vm527_vm1, %v3125_v23 }
 0x165   : > { %v3175_v20 = vpop.eup %3174 }
 0x166   : > { %659 = vrot.lane.b32.xlu0 %v3175_v20, %s3453_s23 }
 0x167   : > { %v3177_v21 = vpop.eup %3176 }
 0x168   : > { %v3179_v24 = vpop.eup %3178 }
 0x169   : > { %v647_v25 = vadd.f32 1.0, %v3179_v24  ;;  %v3181_v26 = vpop.eup %3180 }
 0x16a   : > { %661 = vrot.lane.b32.xlu0 %v3177_v21, %s3453_s23  ;;  %v648_v27 = vadd.f32 1.0, %v3181_v26  ;;  %v412_v21 = vld [vmem:[%s4319_s4] sm:$0xff] }
 0x16b   : > { %3182 = vrcp.f32 %v647_v25  ;;  %v3777_v24 = vpack.c.bf16 %v413_v22, %v412_v21  ;;  %v3855_v21 = vld [vmem:[#allocation7 + $0xa0] sm:$0xff]  }
 0x16c   : > { %3184 = vrcp.f32 %v648_v27 }
 0x175   : > { %v3183_v28 = vpop.eup %3182 }
 0x176   : > { %v3185_v31 = vpop.eup %3184  ;;  %v655_v34 = vmul.f32 0.0, %v3183_v28 }
 0x177   : > { %v656_v37 = vmul.f32 0.0, %v3185_v31 }
 0x1d8   : > { %v660_v29 = vpop.permute.xlu0 %659 }
 0x1d9   : > { %v665_v30 = vmul.f32 %v3183_v28, %v660_v29 }
 0x1db   : > { %669 = vrot.lane.b32.xlu1 %v665_v30, %s3454_s11  ;;  %v414_v30 = vld [vmem:[%s4319_s4 + $0x10] sm:$0xff] }
 0x1dc   : > { %v662_v32 = vpop.permute.xlu0 %661 }
 0x1dd   : > { %v666_v33 = vmul.f32 %v3185_v31, %v662_v32 }
 0x1df   : > { %671 = vrot.lane.b32.xlu1 %v666_v33, %s3454_s11 }
 0x24d   : > { %v670_v35 = vpop.permute.xlu1 %669 }
 0x24e   : > { %v3724_v36 = vadd.f32 %v670_v35, %v655_v34 }
 0x250   : > { %3186 = vtanh.f32 %v3724_v36 }
 0x251   : > { %v672_v38 = vpop.permute.xlu1 %671 }
 0x252   : > { %v3727_v39 = vadd.f32 %v672_v38, %v656_v37 }
 0x254   : > { %3188 = vtanh.f32 %v3727_v39 }
 0x25a   : > { %v3187_v41 = vpop.eup %3186 }
 0x25b   : > { %681 = vrot.lane.b32.xlu0 %v3187_v41, %s3453_s23 }
 0x25e   : > { %v3189_v42 = vpop.eup %3188 }
 0x25f   : > { %683 = vrot.lane.b32.xlu1 %v3189_v42, %s3453_s23 }
 0x2cd   : > { %v682_v43 = vpop.permute.xlu0 %681 }
 0x2ce   : > { %v3739_v45 = vmul.f32 %v3183_v28, %v682_v43 }
 0x2d1   : > { %v684_v44 = vpop.permute.xlu1 %683 }
 0x2d2   : > { %v3741_v46 = vmul.f32 %v3185_v31, %v684_v44  ;;  %v415_v31 = vld [vmem:[%s4319_s4 + $0x18] sm:$0xff] }
 0x2d3   : > { %v3796_v32 = vpack.c.bf16 %v415_v31, %v414_v30  ;;  %v3865_v31 = vld [vmem:[#allocation7 + $0xe8] sm:$0xff]  }
 0x2d4   : > { %v692_v47 = vpack.c.bf16 %v3741_v46, %v3739_v45 }
 0x2d6   : > { %694 = vrot.lane.b32.xlu0 %v692_v47, %s3454_s11 }
 0x348   : > { %v695_v50 = vpop.permute.xlu0 %694 }
 0x349   : > { %2908 = vmatmul.mubr.msk.bf16.vlgmr.msra.gmra.mrb[8].mxu0 %vm527_vm1, %v695_v50 }
 0x34a   : > { %2920 = vmatpush3.bf16.msra.mxu0 %v3676_v1  ;;  %2923 = vmatprep.mubr.msk.bf16.mxu0 %vm3451_vm0, %v3450_v0 }
 0x34b   : > { %2921 = vmatprep.subr.bf16.mxu0 %v3450_v0 }
 0x34e   : > { %2922 = vmatpush3.bf16.msra.mxu0 %v3678_v2 }
 0x34f   : > { %2969 = vmatprep.subr.bf16.mxu0 %v3777_v24 }
 0x41c   : > { %v733_v53 = vpop.f32.mrb[8].mxu0 }
 0x41d   : > { %v783_v54 = vadd.f32 %v782_v48, %v733_v53  ;;  %v2909_v55 = vpop.f32.mrb[9].mxu0  ;;  %v3811_v48 = vld [vmem:[%s4320_s5] ss:$0 sm:$0xff] }
 0x41e   : > { %v736_v56 = vpop.f32.mrb[10].mxu0  ;;  %v992_v55 = vmul.f32 %v3741_v46, %v3741_v46 }
 0x41f   : > { %v789_v57 = vadd.f32 %v3716_v11, %v783_v54  ;;  %v786_v58 = vadd.f32 %v785_v51, %v736_v56  ;;  %v2910_v59 = vpop.f32.mrb[11].mxu0  ;;  %v991_v56 = vmul.f32 %v3739_v45, %v3739_v45 }
 0x421   : > { %3190 = vtanh.f32 %v789_v57  ;;  %v790_v60 = vadd.f32 %v3716_v11, %v786_v58  ;;  %v2582_v63 = vmul.f32 -1.442695, %v789_v57 }
 0x423   : > { %3192 = vtanh.f32 %v790_v60  ;;  %v2583_v0 = vmul.f32 -1.442695, %v790_v60 }
 0x424   : > { %3194 = vpow2.f32 %v2582_v63 }
 0x425   : > { %3196 = vpow2.f32 %v2583_v0 }
 0x42b   : > { %v3191_v61 = vpop.eup %3190 }
 0x42c   : > { %809 = vrot.lane.b32.xlu1 %v3191_v61, %s3453_s23 }
 0x42d   : > { %v3193_v62 = vpop.eup %3192 }
 0x42e   : > { %811 = vrot.lane.b32.xlu0 %v3193_v62, %s3453_s23  ;;  %v3195_v1 = vpop.eup %3194 }
 0x42f   : > { %v3197_v2 = vpop.eup %3196  ;;  %v797_v3 = vadd.f32 1.0, %v3195_v1 }
 0x430   : > { %v798_v4 = vadd.f32 1.0, %v3197_v2 }
 0x431   : > { %3198 = vrcp.f32 %v797_v3 }
 0x432   : > { %3200 = vrcp.f32 %v798_v4 }
 0x43b   : > { %v3199_v6 = vpop.eup %3198 }
 0x43c   : > { %v3201_v9 = vpop.eup %3200  ;;  %v805_v13 = vmul.f32 %v3199_v6, %v3724_v36  ;;  %v932_v36 = vpop.f32.mrb[4].mxu1 }
 0x43d   : > { %v806_v16 = vmul.f32 %v3201_v9, %v3727_v39  ;;  %v2933_v37 = vpop.f32.mrb[5].mxu1 }
 0x43e   : > { %v935_v38 = vpop.f32.mrb[6].mxu1  ;;  %v3876_v37 = vld [vmem:[#allocation7 + $0xf0] sm:$0xff]  }
 0x43f   : > { %v2934_v39 = vpop.f32.mrb[7].mxu1  ;;  %4368 = vst [vmem:[#allocation19_spill] sm:$0xff] %v3876_v37 }
 0x440   : > { %v3881_v39 = vld [vmem:[#allocation7 + $0xb0] sm:$0xff]  }
 0x441   : > { %4369 = vst [vmem:[#allocation20_spill] sm:$0xff] %v3881_v39 }
 0x49e   : > { %v810_v7 = vpop.permute.xlu1 %809 }
 0x49f   : > { %v815_v8 = vmul.f32 %v3199_v6, %v810_v7 }
 0x4a0   : > { %v812_v10 = vpop.permute.xlu0 %811 }
 0x4a1   : > { %819 = vrot.lane.b32.xlu1 %v815_v8, %s3454_s11  ;;  %v816_v12 = vmul.f32 %v3201_v9, %v812_v10  ;;  %v4341_v8 = vmov 3   ;;  %v3831_v10 = vld [vmem:[#allocation7 + $0x80] sm:$0xff]  }
 0x4a2   : > { %3083 = vset.pattern.permute.xlu0 %v4341_v8  ;;  %3084 = vset.pattern.permute.xlu1 %v4341_v8 }
 0x4a3   : > { %821 = vrot.lane.b32.xlu0 %v816_v12, %s3454_s11  ;;  %v3833_v12 = vld [vmem:[#allocation7 + $0xc8] sm:$0xff]  }
 0x513   : > { %v820_v14 = vpop.permute.xlu1 %819 }
 0x514   : > { %v3759_v15 = vadd.f32 %v820_v14, %v805_v13  ;;  %v3837_v13 = vld [vmem:[#allocation7 + $0x88] sm:$0xff]   ;;  %v3840_v14 = vld [vmem:[#allocation7 + $0xd0] sm:$0xff]  }
 0x515   : > { %v822_v17 = vpop.permute.xlu0 %821 }
 0x516   : > { %3202 = vtanh.f32 %v3759_v15  ;;  %v3763_v18 = vadd.f32 %v822_v17, %v806_v16  ;;  %v3843_v16 = vld [vmem:[#allocation7 + $0x90] sm:$0xff]   ;;  %v3846_v17 = vld [vmem:[#allocation7 + $0xd8] sm:$0xff]  }
 0x518   : > { %3204 = vtanh.f32 %v3763_v18 }
 0x520   : > { %v3203_v19 = vpop.eup %3202 }
 0x521   : > { %831 = vrot.lane.b32.xlu1 %v3203_v19, %s3453_s23  ;;  %v3849_v19 = vld [vmem:[#allocation7 + $0x98] sm:$0xff]  }
 0x522   : > { %v3205_v20 = vpop.eup %3204 }
 0x523   : > { %833 = vrot.lane.b32.xlu0 %v3205_v20, %s3453_s23  ;;  %v3852_v20 = vld [vmem:[#allocation7 + $0xe0] sm:$0xff]  }
 0x527   : > { %1029 = vrot.lane.b32.xlu0 %v3739_v45, %s3454_s11 }
 0x593   : > { %v832_v25 = vpop.permute.xlu1 %831 }
 0x594   : > { %v3781_v27 = vmul.f32 %v3199_v6, %v832_v25 }
 0x595   : > { %v834_v26 = vpop.permute.xlu0 %833 }
 0x596   : > { %v3783_v28 = vmul.f32 %v3201_v9, %v834_v26  ;;  %v3829_v9 = vld [vmem:[#allocation7 + $0xc0] sm:$0xff]  }
 0x598   : > { %v842_v29 = vpack.c.bf16 %v3783_v28, %v3781_v27 }
 0x599   : > { %v1030_v34 = vpop.permute.xlu0 %1029 }
 0x59a   : > { %844 = vrot.lane.b32.xlu1 %v842_v29, %s3454_s11 }
 0x59e   : > { %1031 = vrot.lane.b32.xlu1 %v3741_v46, %s3454_s11 }
 0x60c   : > { %v845_v33 = vpop.permute.xlu1 %844 }
 0x60d   : > { %2924 = vmatmul.mubr.msk.bf16.vlgmr.msra.gmra.mrb[12].mxu0 %vm527_vm1, %v845_v33  ;;  %v3867_v33 = vld [vmem:[#allocation7 + $0xa8] sm:$0xff]  }
 0x60e   : > { %2971 = vmatpush3.bf16.msra.mxu0 %v3777_v24  ;;  %2943 = vmatprep.mubr.msk.f32.mxu0 %vm527_vm1, %v1030_v34  ;;  %v4335_v34 = vmov 4  }
 0x60f   : > { %2973 = vmatprep.subr.bf16.mxu0 %v3796_v32 }
 0x610   : > { %v1032_v35 = vpop.permute.xlu1 %1031 }
 0x612   : > { %2975 = vmatpush3.bf16.msra.mxu0 %v3796_v32 }
 0x613   : > { %2699 = vmatprep.subr.bf16.mxu0 %v3829_v9 }
 0x615   : > { %2944 = vmatmul.mubr.msk.f32.vlgmr.msra.gmra.mrb[16].mxu0 %vm527_vm1, %v1032_v35  ;;  %v4339_v35 = vmov 2  }
 0x616   : > { %2700 = vmatpush3.bf16.msra.mxu0 %v3831_v10 }
 0x617   : > { %2701 = vmatprep.subr.bf16.mxu0 %v3833_v12 }
 0x61a   : > { %2702 = vmatpush3.bf16.msra.mxu0 %v3837_v13 }
 0x61b   : > { %2703 = vmatprep.subr.bf16.mxu0 %v3840_v14 }
 0x61e   : > { %2704 = vmatpush3.bf16.msra.mxu0 %v3843_v16 }
 0x61f   : > { %2705 = vmatprep.subr.bf16.mxu0 %v3846_v17 }
 0x622   : > { %2706 = vmatpush3.bf16.msra.mxu0 %v3849_v19 }
 0x623   : > { %2707 = vmatprep.subr.bf16.mxu0 %v3852_v20 }
 0x626   : > { %2708 = vmatpush3.bf16.msra.mxu0 %v3855_v21 }
 0x627   : > { %2709 = vmatprep.subr.bf16.mxu0 %v3865_v31 }
 0x62a   : > { %2710 = vmatpush3.bf16.msra.mxu0 %v3867_v33 }
 0x62b   : > { %2711 = vmatprep.subr.bf16.mxu0 %v3876_v37 }
 0x62e   : > { %2712 = vmatpush3.bf16.msra.mxu0 %v3881_v39 }
 0x6e0   : > { %v883_v40 = vpop.f32.mrb[12].mxu0 }
 0x6e1   : > { %v3804_v41 = vadd.f32 %v932_v36, %v883_v40  ;;  %v2925_v42 = vpop.f32.mrb[13].mxu0  ;;  %v3874_v36 = vld [vmem:[#allocation7 + $0x40] sm:$0xff]   ;;  %v4333_v40 = vmov 5  }
 0x6e2   : > { %v886_v43 = vpop.f32.mrb[14].mxu0  ;;  %2677 = vmatprep.subr.bf16.mxu1 %v3874_v36  ;;  %v3888_v42 = vld [vmem:[#allocation7 + $0x48] sm:$0xff]  }
 0x6e3   : > { %v3806_v44 = vadd.f32 %v935_v38, %v886_v43  ;;  %v2926_v47 = vpop.f32.mrb[15].mxu0  ;;  %v3879_v38 = vld [vmem:[#allocation7] sm:$0xff]   ;;  %v3890_v43 = vld [vmem:[#allocation7 + $0xf8] sm:$0xff]  }
 0x6e4   : > { %2678 = vmatpush3.bf16.msra.mxu1 %v3879_v38  ;;  %4370 = vst [vmem:[#allocation21_spill] sm:$0xff] %v3890_v43  ;;  %v3894_v47 = vld [vmem:[#allocation7 + $0x8] sm:$0xff]   ;;  %2713 = vmatprep.subr.bf16.mxu0 %v3890_v43 }
 0x6e5   : > { %2679 = vmatprep.subr.bf16.mxu1 %v3888_v42 }
 0x6e8   : > { %v2945_v49 = vpop.f32.mrb[16].mxu0  ;;  %2680 = vmatpush3.bf16.msra.mxu1 %v3894_v47 }
 0x6e9   : > { %v1109_v50 = vadd.f32 %v2945_v49, %v3811_v48  ;;  %v1103_v51 = vpop.f32.mrb[17].mxu0  ;;  %v3896_v49 = vld [vmem:[#allocation7 + $0xb8] sm:$0xff]  }
 0x6ea   : > { %v1104_v52 = vadd.f32 %v3811_v48, %v1103_v51  ;;  %4371 = vst [vmem:[#allocation22_spill] sm:$0xff] %v3896_v49  ;;  %2714 = vmatpush3.bf16.msra.mxu0 %v3896_v49  ;;  %v3904_v51 = vld [vmem:[#allocation7 + $0x50] sm:$0xff]  }
 0x6eb   : > { %v1116_v53 = vsel %vm1112_vm2, %v1109_v50, -inf  ;;  %2977 = vmatprep.subr.bf16.mxu0 %v3777_v24  ;;  %2681 = vmatprep.subr.bf16.mxu1 %v3904_v51 }
 0x6ec   : > { %1117 = vmax.xlane.f32.xlu1 %v1116_v53  ;;  %v1113_v54 = vsel %vm1112_vm2, %v1104_v52, -inf  ;;  %v4343_v53 = vmov 1  }
 0x6ed   : > { %1114 = vmax.xlane.f32.xlu0 %v1113_v54  ;;  %v3916_v54 = vld [vmem:[#allocation7 + $0x58] sm:$0xff]  }
 0x6fd   : > { %997 = vrot.lane.b32.xlu1 %v992_v55, %s3454_s11  ;;  %v3918_v55 = vld [vmem:[#allocation7 + $0x18] sm:$0xff]  }
 0x703   : > { %995 = vrot.lane.b32.xlu0 %v991_v56, %s3454_s11  ;;  %v3924_v56 = vld [vmem:[#allocation7 + $0x60] sm:$0xff]  }
 0x779   : > { %v1118_v57 = vpop.xlane.xlu1 %1117 }
 0x77a   : > { %v1120_v58 = vsub.f32 %v1109_v50, %v1118_v57  ;;  %v1115_v59 = vpop.xlane.xlu0 %1114  ;;  %v1640_v50 = vmul.f32 %v3781_v27, %v3781_v27  ;;  %v3927_v57 = vld [vmem:[#allocation7 + $0x20] sm:$0xff]  }
 0x77b   : > { %v1119_v60 = vsub.f32 %v1104_v52, %v1115_v59  ;;  %v3910_v52 = vld [vmem:[#allocation7 + $0x10] sm:$0xff]   ;;  %v3934_v59 = vld [vmem:[#allocation7 + $0x28] sm:$0xff]  }
 0x77c   : > { %v1123_v61 = vmul.f32 1.442695, %v1120_v58  ;;  %2682 = vmatpush3.bf16.msra.mxu1 %v3910_v52  ;;  %v3931_v58 = vld [vmem:[#allocation7 + $0x68] sm:$0xff]  }
 0x77d   : > { %v1121_v62 = vmul.f32 1.442695, %v1119_v60  ;;  %v998_v6 = vpop.permute.xlu1 %997  ;;  %2683 = vmatprep.subr.bf16.mxu1 %v3916_v54  ;;  %v3938_v60 = vld [vmem:[#allocation7 + $0x70] sm:$0xff]  }
 0x77e   : > { %3206 = vpow2.f32 %v1123_v61  ;;  %v996_v3 = vpop.permute.xlu0 %995  ;;  %v1004_v7 = vsel %vm527_vm1, %v998_v6, 0.0  ;;  %v3942_v61 = vld [vmem:[#allocation7 + $0x30] sm:$0xff]  }
 0x77f   : > { %3208 = vpow2.f32 %v1121_v62  ;;  %v1001_v4 = vsel %vm527_vm1, %v996_v3, 0.0  ;;  %v3945_v62 = vld [vmem:[#allocation7 + $0x78] sm:$0xff]   ;;  %v1641_v3 = vmul.f32 %v3783_v28, %v3783_v28 }
 0x780   : > { %2684 = vmatpush3.bf16.msra.mxu1 %v3918_v55 }
 0x781   : > { %2685 = vmatprep.subr.bf16.mxu1 %v3924_v56 }
 0x784   : > { %2686 = vmatpush3.bf16.msra.mxu1 %v3927_v57 }
 0x785   : > { %2687 = vmatprep.subr.bf16.mxu1 %v3931_v58 }
 0x788   : > { %v3207_v63 = vpop.eup %3206  ;;  %2688 = vmatpush3.bf16.msra.mxu1 %v3934_v59 }
 0x789   : > { %v3209_v0 = vpop.eup %3208  ;;  %v1128_v1 = vsel %vm1112_vm2, %v3207_v63, 0.0  ;;  %2689 = vmatprep.subr.bf16.mxu1 %v3938_v60 }
 0x78a   : > { %1129 = vadd.xlane.f32.xlu1 %v1128_v1  ;;  %v1125_v2 = vsel %vm1112_vm2, %v3209_v0, 0.0  ;;  %v1624_v1 = vmul.f32 %v3781_v27, %v3739_v45 }
 0x78b   : > { %1126 = vadd.xlane.f32.xlu0 %v1125_v2  ;;  %v1625_v2 = vmul.f32 %v3783_v28, %v3741_v46 }
 0x78c   : > { %2690 = vmatpush3.bf16.msra.mxu1 %v3942_v61 }
 0x78d   : > { %2691 = vmatprep.subr.bf16.mxu1 %v3945_v62 }
 0x78f   : > { %1002 = vadd.xlane.f32.xlu0 %v1001_v4 }
 0x793   : > { %1005 = vadd.xlane.f32.xlu0 %v1004_v7 }
 0x817   : > { %v1130_v22 = vpop.xlane.xlu1 %1129 }
 0x818   : > { %3210 = vrcp.f32 %v1130_v22  ;;  %v1127_v23 = vpop.xlane.xlu0 %1126 }
 0x819   : > { %3212 = vrcp.f32 %v1127_v23 }
 0x81c   : > { %v1003_v4 = vpop.xlane.xlu0 %1002 }
 0x81d   : > { %v1007_v22 = vsub.f32 %v1003_v4, %v1003_v4  ;;  %v3980_v4 = vld [vmem:[%s3974_s10] sm:$0xff] }
 0x820   : > { %v1006_v6 = vpop.xlane.xlu0 %1005 }
 0x821   : > { %v1008_v7 = vsub.f32 %v1006_v6, %v1006_v6 }
 0x822   : > { %v3211_v25 = vpop.eup %3210 }
 0x823   : > { %v3213_v26 = vpop.eup %3212  ;;  %v3859_v29 = vmul.f32 %v3211_v25, %v3207_v63  ;;  %v3949_v63 = vld [vmem:[#allocation7 + $0x38] sm:$0xff]   ;;  %v1011_v23 = vmul.f32 1.442695, %v1008_v7  ;;  %v1009_v25 = vmul.f32 1.442695, %v1007_v22 }
 0x824   : > { %v3861_v30 = vmul.f32 %v3213_v26, %v3209_v0  ;;  %2692 = vmatpush3.bf16.msra.mxu1 %v3949_v63  ;;  %v3953_v0 = vld [vmem:[#allocation7 + $0x140] sm:$0xff]  }
 0x825   : > { %1172 = vperm.xlu0 %3083, %v3859_v29   ;;  %2721 = vmatprep.subr.bf16.mxu1 %v3953_v0  ;;  %3214 = vpow2.f32 %v1011_v23 }
 0x826   : > { %1168 = vperm.xlu1 %3084, %v3861_v30   ;;  %3216 = vpow2.f32 %v1009_v25 }
 0x829   : > { %3089 = vset.pattern.permute.xlu0 %v4335_v34 }
 0x82a   : > { %1182 = vperm.xlu0 %3089, %v3859_v29   ;;  %3085 = vset.pattern.permute.xlu1 %v4339_v35  ;;  %v4030_v35 = vld [vmem:[#allocation7 + $0x158] sm:$0xff]  }
 0x82b   : > { %1158 = vperm.xlu1 %3085, %v3861_v30   ;;  %4374 = vst [vmem:[#allocation25_spill] sm:$0xff] %v4030_v35 }
 0x82e   : > { %3090 = vset.pattern.permute.xlu0 %v4333_v40 }
 0x82f   : > { %1188 = vperm.xlu0 %3090, %v3861_v30   ;;  %1162 = vperm.xlu1 %3085, %v3859_v29   ;;  %v3215_v26 = vpop.eup %3214 }
 0x830   : > { %3218 = vrcp.f32 %v3215_v26 }
 0x833   : > { %1644 = vrot.lane.b32.xlu0 %v1640_v50, %s3454_s11  ;;  %1708 = vrot.lane.b32.xlu1 %v3781_v27, %s3454_s11 }
 0x834   : > { %3086 = vset.pattern.permute.xlu1 %v4343_v53  ;;  %3093 = vset.pattern.permute.xlu0 %v4337_v5 }
 0x837   : > { %1710 = vrot.lane.b32.xlu1 %v3783_v28, %s3454_s11 }
 0x83b   : > { %1152 = vperm.xlu1 %3086, %v3859_v29  }
 0x83f   : > { %1148 = vperm.xlu1 %3086, %v3861_v30  }
 0x843   : > { %3087 = vset.pattern.permute.xlu1 %v4337_v5 }
 0x844   : > { %1137 = vperm.xlu1 %3087, %v3861_v30  }
 0x848   : > { %1142 = vperm.xlu1 %3087, %v3859_v29  }
 0x84c   : > { %3088 = vset.pattern.permute.xlu1 %v4333_v40 }
 0x84d   : > { %1192 = vperm.xlu1 %3088, %v3859_v29   ;;  %v3217_v29 = vpop.eup %3216 }
 0x84e   : > { %3220 = vrcp.f32 %v3217_v29 }
 0x851   : > { %1628 = vrot.lane.b32.xlu1 %v1624_v1, %s3454_s11 }
 0x852   : > { %3091 = vset.pattern.permute.xlu1 %v4335_v34 }
 0x855   : > { %1630 = vrot.lane.b32.xlu1 %v1625_v2, %s3454_s11 }
 0x859   : > { %1178 = vperm.xlu1 %3091, %v3861_v30   ;;  %v3219_v30 = vpop.eup %3218 }
 0x85a   : > { %v3221_v50 = vpop.eup %3220  ;;  %v1018_v1 = vmul.f32 %v3219_v30, %v3215_v26 }
 0x85b   : > { %v1017_v2 = vmul.f32 %v3221_v50, %v3217_v29 }
 0x85d   : > { %1646 = vrot.lane.b32.xlu1 %v1641_v3, %s3454_s11  ;;  %v3977_v3 = vld [vmem:[%s3974_s10 + $0x8] sm:$0xff]  ;;  %v3986_v7 = vmul.f32 %v1017_v2, %v3980_v4 }
 0x85e   : > { %3092 = vset.pattern.permute.xlu1 %v4337_v5  ;;  %v3983_v6 = vmul.f32 %v1018_v1, %v3977_v3 }
 0x8a4   : > { %v1173_v22 = vpop.permute.xlu0 %1172 }
 0x8a5   : > { %v1176_v23 = vmul.f32 %v1173_v22, %v3983_v6  ;;  %v1169_v25 = vpop.permute.xlu1 %1168 }
 0x8a6   : > { %v1175_v40 = vmul.f32 %v1169_v25, %v3986_v7 }
 0x8a8   : > { %v1200_v34 = vpack.c.bf16 %v1176_v23, %v1175_v40 }
 0x8aa   : > { %v1159_v5 = vpop.permute.xlu1 %1158  ;;  %1564 = vmatprep.mubr.bf16.mxu0 %v1200_v34 }
 0x8ab   : > { %v1165_v29 = vmul.f32 %v1159_v5, %v3986_v7 }
 0x8ae   : > { %v1163_v26 = vpop.permute.xlu1 %1162 }
 0x8af   : > { %v1166_v30 = vmul.f32 %v1163_v26, %v3983_v6  ;;  %v1183_v26 = vpop.permute.xlu0 %1182 }
 0x8b0   : > { %v1186_v53 = vmul.f32 %v1183_v26, %v3983_v6  ;;  %v4064_v26 = vld [vmem:[#allocation7 + $0x178] sm:$0xff]  }
 0x8b1   : > { %v1199_v50 = vpack.c.bf16 %v1166_v30, %v1165_v29 }
 0x8b2   : > { %v1709_v1 = vpop.permute.xlu1 %1708 }
 0x8b3   : > { %1565 = vmatmul.mubr.bf16.vlgmr.msra.gmra.mrb[20].mxu0 %v1199_v50 }
 0x8b4   : > { %2979 = vmatpush3.bf16.msra.mxu0 %v3777_v24  ;;  %2954 = vmatprep.mubr.msk.f32.mxu0 %vm527_vm1, %v1709_v1  ;;  %v4009_v1 = vld [vmem:[#allocation7 + $0x100] sm:$0xff]  }
 0x8b5   : > { %2981 = vmatprep.subr.bf16.mxu0 %v3796_v32 }
 0x8b6   : > { %v1711_v2 = vpop.permute.xlu1 %1710 }
 0x8b8   : > { %2983 = vmatpush3.bf16.msra.mxu0 %v3796_v32 }
 0x8b9   : > { %2749 = vmatprep.subr.bf16.mxu0 %v3874_v36 }
 0x8ba   : > { %v1153_v34 = vpop.permute.xlu1 %1152 }
 0x8bb   : > { %2955 = vmatmul.mubr.msk.f32.vlgmr.msra.gmra.mrb[18].mxu0 %vm527_vm1, %v1711_v2  ;;  %v1156_v40 = vmul.f32 %v1153_v34, %v3983_v6  ;;  %v1189_v2 = vpop.permute.xlu0 %1188 }
 0x8bc   : > { %2750 = vmatpush3.bf16.msra.mxu0 %v3879_v38 }
 0x8bd   : > { %2751 = vmatprep.subr.bf16.mxu0 %v3888_v42 }
 0x8be   : > { %v1149_v5 = vpop.permute.xlu1 %1148 }
 0x8bf   : > { %v1155_v22 = vmul.f32 %v1149_v5, %v3986_v7  ;;  %v4012_v5 = vld [vmem:[#allocation7 + $0x148] sm:$0xff]  }
 0x8c0   : > { %2752 = vmatpush3.bf16.msra.mxu0 %v3894_v47 }
 0x8c1   : > { %v1198_v23 = vpack.c.bf16 %v1156_v40, %v1155_v22  ;;  %2753 = vmatprep.subr.bf16.mxu0 %v3904_v51  ;;  %v1195_v22 = vmul.f32 %v1189_v2, %v3986_v7 }
 0x8c3   : > { %v1138_v25 = vpop.permute.xlu1 %1137  ;;  %1523 = vmatprep.mubr.bf16.mxu1 %v1198_v23 }
 0x8c4   : > { %2754 = vmatpush3.bf16.msra.mxu0 %v3910_v52  ;;  %v1145_v30 = vmul.f32 %v1138_v25, %v3986_v7  ;;  %v4018_v25 = vld [vmem:[#allocation7 + $0x108] sm:$0xff]  }
 0x8c5   : > { %2755 = vmatprep.subr.bf16.mxu0 %v3916_v54 }
 0x8c7   : > { %v1143_v29 = vpop.permute.xlu1 %1142 }
 0x8c8   : > { %v1146_v50 = vmul.f32 %v1143_v29, %v3983_v6  ;;  %2756 = vmatpush3.bf16.msra.mxu0 %v3918_v55  ;;  %v4022_v29 = vld [vmem:[#allocation7 + $0x150] sm:$0xff]  }
 0x8c9   : > { %2757 = vmatprep.subr.bf16.mxu0 %v3924_v56  ;;  %4372 = vst [vmem:[#allocation23_spill] sm:$0xff] %v4022_v29 }
 0x8ca   : > { %v1197_v34 = vpack.c.bf16 %v1146_v50, %v1145_v30 }
 0x8cc   : > { %v1193_v40 = vpop.permute.xlu1 %1192  ;;  %1524 = vmatmul.mubr.bf16.vlgmr.msra.gmra.mrb[8].mxu1 %v1197_v34  ;;  %2758 = vmatpush3.bf16.msra.mxu0 %v3927_v57  ;;  %v4027_v34 = vld [vmem:[#allocation7 + $0x110] sm:$0xff]  }
 0x8cd   : > { %v1196_v23 = vmul.f32 %v1193_v40, %v3983_v6  ;;  %2722 = vmatpush3.bf16.msra.mxu1 %v4009_v1  ;;  %2759 = vmatprep.subr.bf16.mxu0 %v3931_v58  ;;  %4373 = vst [vmem:[#allocation24_spill] sm:$0xff] %v4027_v34  ;;  %v1645_v40 = vpop.permute.xlu0 %1644  ;;  %v4058_v6 = vld [vmem:[#allocation7 + $0x170] sm:$0xff]  }
 0x8ce   : > { %2723 = vmatprep.subr.bf16.mxu1 %v4012_v5 }
 0x8cf   : > { %v1202_v30 = vpack.c.bf16 %v1196_v23, %v1195_v22  ;;  %v1650_v23 = vsel %vm527_vm1, %v1645_v40, 0.0  ;;  %v4051_v40 = vld [vmem:[#allocation7 + $0x168] sm:$0xff]  }
 0x8d0   : > { %v1629_v50 = vpop.permute.xlu1 %1628  ;;  %2760 = vmatpush3.bf16.msra.mxu0 %v3934_v59 }
 0x8d1   : > { %2724 = vmatpush3.bf16.msra.mxu1 %v4018_v25  ;;  %1605 = vmatprep.mubr.bf16.mxu1 %v1202_v30  ;;  %v1634_v2 = vsel %vm527_vm1, %v1629_v50, 0.0  ;;  %v4037_v30 = vld [vmem:[#allocation7 + $0x118] sm:$0xff]   ;;  %v4040_v50 = vld [vmem:[#allocation7 + $0x160] sm:$0xff]  }
 0x8d2   : > { %1635 = vadd.xlane.f32.xlu0 %v1634_v2  ;;  %2725 = vmatprep.subr.bf16.mxu1 %v4022_v29  ;;  %v4055_v29 = vld [vmem:[#allocation7 + $0x128] sm:$0xff]  }
 0x8d3   : > { %2761 = vmatprep.subr.bf16.mxu0 %v3938_v60 }
 0x8d4   : > { %v1631_v8 = vpop.permute.xlu1 %1630  ;;  %2762 = vmatpush3.bf16.msra.mxu0 %v3942_v61 }
 0x8d5   : > { %2726 = vmatpush3.bf16.msra.mxu1 %v4027_v34  ;;  %v1637_v22 = vsel %vm527_vm1, %v1631_v8, 0.0  ;;  %2763 = vmatprep.subr.bf16.mxu0 %v3945_v62  ;;  %v4047_v8 = vld [vmem:[#allocation7 + $0x120] sm:$0xff]  }
 0x8d6   : > { %1638 = vadd.xlane.f32.xlu1 %v1637_v22  ;;  %1651 = vadd.xlane.f32.xlu0 %v1650_v23 }
 0x8d7   : > { %2727 = vmatprep.subr.bf16.mxu1 %v4030_v35 }
 0x8d8   : > { %v1179_v2 = vpop.permute.xlu1 %1178  ;;  %2764 = vmatpush3.bf16.msra.mxu0 %v3949_v63 }
 0x8d9   : > { %v1185_v34 = vmul.f32 %v1179_v2, %v3986_v7  ;;  %2728 = vmatpush3.bf16.msra.mxu1 %v4037_v30  ;;  %2793 = vmatprep.subr.bf16.mxu0 %v3953_v0  ;;  %v4061_v7 = vld [vmem:[#allocation7 + $0x130] sm:$0xff]  }
 0x8da   : > { %2729 = vmatprep.subr.bf16.mxu1 %v4040_v50 }
 0x8db   : > { %v1201_v22 = vpack.c.bf16 %v1186_v53, %v1185_v34  ;;  %v4067_v53 = vld [vmem:[#allocation7 + $0x138] sm:$0xff]  }
 0x8dc   : > { %v1647_v23 = vpop.permute.xlu1 %1646  ;;  %4375 = vst [vmem:[#allocation26_spill] sm:$0xff] %v4067_v53 }
 0x8dd   : > { %2730 = vmatpush3.bf16.msra.mxu1 %v4047_v8  ;;  %v1653_v35 = vsel %vm527_vm1, %v1647_v23, 0.0 }
 0x8de   : > { %1654 = vadd.xlane.f32.xlu0 %v1653_v35  ;;  %2731 = vmatprep.subr.bf16.mxu1 %v4051_v40 }
 0x8e1   : > { %2732 = vmatpush3.bf16.msra.mxu1 %v4055_v29 }
 0x8e2   : > { %2733 = vmatprep.subr.bf16.mxu1 %v4058_v6 }
 0x8e5   : > { %2734 = vmatpush3.bf16.msra.mxu1 %v4061_v7 }
 0x8e6   : > { %2735 = vmatprep.subr.bf16.mxu1 %v4064_v26 }
 0x8e9   : > { %2736 = vmatpush3.bf16.msra.mxu1 %v4067_v53 }
 0x8ea   : > { %2771 = vmatprep.subr.bf16.mxu1 %v3829_v9 }
 0x8ec   : > { %1606 = vmatmul.mubr.bf16.vlgmr.msra.gmra.mrb[12].mxu1 %v1201_v22 }
 0x8ed   : > { %2772 = vmatpush3.bf16.msra.mxu1 %v3831_v10 }
 0x8ee   : > { %2773 = vmatprep.subr.bf16.mxu1 %v3833_v12 }
 0x8f1   : > { %2774 = vmatpush3.bf16.msra.mxu1 %v3837_v13 }
 0x8f2   : > { %2775 = vmatprep.subr.bf16.mxu1 %v3840_v14 }
 0x8f5   : > { %2776 = vmatpush3.bf16.msra.mxu1 %v3843_v16 }
 0x8f6   : > { %2777 = vmatprep.subr.bf16.mxu1 %v3846_v17 }
 0x8f9   : > { %2778 = vmatpush3.bf16.msra.mxu1 %v3849_v19 }
 0x8fa   : > { %2779 = vmatprep.subr.bf16.mxu1 %v3852_v20 }
 0x8fd   : > { %2780 = vmatpush3.bf16.msra.mxu1 %v3855_v21 }
 0x8fe   : > { %2781 = vmatprep.subr.bf16.mxu1 %v3865_v31 }
 0x901   : > { %2782 = vmatpush3.bf16.msra.mxu1 %v3867_v33 }
 0x902   : > { %2783 = vmatprep.subr.bf16.mxu1 %v3876_v37 }
 0x905   : > { %2784 = vmatpush3.bf16.msra.mxu1 %v3881_v39 }
 0x906   : > { %2785 = vmatprep.subr.bf16.mxu1 %v3890_v43 }
 0x909   : > { %2786 = vmatpush3.bf16.msra.mxu1 %v3896_v49 }
 0x90a   : > { %2985 = vmatprep.subr.bf16.mxu1 %v3777_v24 }
 0x95f   : > { %v1636_v9 = vpop.xlane.xlu0 %1635 }
 0x963   : > { %v1652_v10 = vpop.xlane.xlu0 %1651  ;;  %v1639_v14 = vpop.xlane.xlu1 %1638 }
 0x964   : > { %v1657_v12 = vsel %vm1656_vm3, %v1636_v9, %v1652_v10 }
 0x965   : > { %v1660_v13 = vsel %vm1659_vm4, %v1657_v12, -inf }
 0x966   : > { %1661 = vmax.xlane.f32.xlu1 %v1660_v13 }
 0x96b   : > { %v1655_v16 = vpop.xlane.xlu0 %1654 }
 0x96c   : > { %v4091_v17 = vsel %vm1656_vm3, %v1639_v14, %v1655_v16  ;;  %v939_v14 = vadd.f32 %v3716_v11, %v3804_v41  ;;  %v940_v16 = vadd.f32 %v3716_v11, %v3806_v44 }
 0x96d   : > { %v1663_v19 = vsel %vm1659_vm4, %v4091_v17, -inf }
 0x96e   : > { %1664 = vmax.xlane.f32.xlu0 %v1663_v19  ;;  %3222 = vtanh.f32 %v939_v14 }
 0x96f   : > { %3224 = vtanh.f32 %v940_v16 }
 0x986   : > { %v2715_v20 = vpop.f32.mrb[20].mxu0 }
 0x987   : > { %v2716_v21 = vpop.f32.mrb[21].mxu0 }
 0x988   : > { %v2717_v31 = vadd.f32 %v2716_v21, %v2715_v20  ;;  %v2718_v33 = vpop.f32.mrb[22].mxu0 }
 0x989   : > { %v2719_v35 = vpop.f32.mrb[23].mxu0 }
 0x98a   : > { %v2720_v34 = vadd.f32 %v2719_v35, %v2718_v33 }
 0x98e   : > { %v2956_v2 = vpop.f32.mrb[18].mxu0 }
 0x98f   : > { %v1788_v22 = vadd.f32 %v2956_v2, %v3811_v48  ;;  %v1782_v23 = vpop.f32.mrb[19].mxu0 }
 0x990   : > { %v1783_v9 = vadd.f32 %v3811_v48, %v1782_v23  ;;  %v3223_v48 = vpop.eup %3222 }
 0x991   : > { %v1794_v10 = vsel %vm1112_vm2, %v1788_v22, -inf }
 0x992   : > { %1795 = vmax.xlane.f32.xlu0 %v1794_v10  ;;  %v1791_v13 = vsel %vm1112_vm2, %v1783_v9, -inf }
 0x993   : > { %1792 = vmax.xlane.f32.xlu1 %v1791_v13  ;;  %v3225_v13 = vpop.eup %3224 }
 0x99f   : > { %v2693_v19 = vpop.f32.mrb[8].mxu1 }
 0x9a0   : > { %v2694_v20 = vpop.f32.mrb[9].mxu1 }
 0x9a1   : > { %v2695_v21 = vadd.f32 %v2694_v20, %v2693_v19  ;;  %v2696_v33 = vpop.f32.mrb[10].mxu1 }
 0x9a2   : > { %v2697_v35 = vpop.f32.mrb[11].mxu1 }
 0x9a3   : > { %v1567_v2 = vadd.f32 %v2717_v31, %v2695_v21  ;;  %v2698_v23 = vadd.f32 %v2697_v35, %v2696_v33  ;;  %v2589_v33 = vmul.f32 -1.442695, %v939_v14  ;;  %v2590_v35 = vmul.f32 -1.442695, %v940_v16 }
 0x9a4   : > { %959 = vrot.lane.b32.xlu1 %v3223_v48, %s3453_s23 }
 0x9a5   : > { %v1570_v10 = vadd.f32 %v2720_v34, %v2698_v23 }
 0x9a8   : > { %961 = vrot.lane.b32.xlu0 %v3225_v13, %s3453_s23 }
 0x9bf   : > { %v2737_v41 = vpop.f32.mrb[12].mxu1 }
 0x9c0   : > { %v2738_v49 = vpop.f32.mrb[13].mxu1 }
 0x9c1   : > { %v2739_v43 = vadd.f32 %v2738_v49, %v2737_v41  ;;  %v2740_v39 = vpop.f32.mrb[14].mxu1 }
 0x9c2   : > { %v2741_v11 = vpop.f32.mrb[15].mxu1 }
 0x9c3   : > { %v2742_v44 = vadd.f32 %v2741_v11, %v2740_v39  ;;  %v4105_v37 = vadd.f32 %v2739_v43, %v1567_v2 }
 0x9c5   : > { %v4107_v19 = vadd.f32 %v2742_v44, %v1570_v10 }
 0x9f3   : > { %v1662_v20 = vpop.xlane.xlu1 %1661 }
 0x9f4   : > { %v1666_v53 = vsub.f32 %v1657_v12, %v1662_v20 }
 0x9f6   : > { %v1668_v31 = vmul.f32 1.442695, %v1666_v53 }
 0x9f8   : > { %3226 = vpow2.f32 %v1668_v31 }
 0x9f9   : > { %3228 = vpow2.f32 %v2589_v33 }
 0x9fa   : > { %3230 = vpow2.f32 %v2590_v35 }
 0x9fb   : > { %v1665_v43 = vpop.xlane.xlu0 %1664 }
 0x9fc   : > { %v1667_v35 = vsub.f32 %v4091_v17, %v1665_v43 }
 0xa02   : > { %v3227_v21 = vpop.eup %3226 }
 0xa03   : > { %v1672_v34 = vsel %vm1659_vm4, %v3227_v21, 0.0  ;;  %v3229_v49 = vpop.eup %3228 }
 0xa04   : > { %1673 = vadd.xlane.f32.xlu0 %v1672_v34  ;;  %v947_v48 = vadd.f32 1.0, %v3229_v49  ;;  %v3231_v23 = vpop.eup %3230  ;;  %v1670_v49 = vmul.f32 1.442695, %v1667_v35 }
 0xa05   : > { %v948_v39 = vadd.f32 1.0, %v3231_v23 }
 0xa06   : > { %3232 = vrcp.f32 %v947_v48 }
 0xa07   : > { %3234 = vrcp.f32 %v948_v39 }
 0xa10   : > { %v4110_v11 = vpop.eup %3232 }
 0xa11   : > { %v3235_v20 = vpop.eup %3234  ;;  %v955_v39 = vmul.f32 %v4110_v11, %v3759_v15 }
 0xa1f   : > { %v1796_v2 = vpop.xlane.xlu0 %1795 }
 0xa20   : > { %v1798_v10 = vsub.f32 %v1788_v22, %v1796_v2  ;;  %v1793_v12 = vpop.xlane.xlu1 %1792 }
 0xa21   : > { %v1797_v53 = vsub.f32 %v1783_v9, %v1793_v12  ;;  %v956_v12 = vmul.f32 %v3235_v20, %v3763_v18  ;;  %v4376_v18 = vmov 1  }
 0xa22   : > { %v1801_v13 = vmul.f32 1.442695, %v1798_v10 }
 0xa23   : > { %v1799_v41 = vmul.f32 1.442695, %v1797_v53  ;;  %v962_v44 = vpop.permute.xlu0 %961 }
 0xa24   : > { %3236 = vpow2.f32 %v1801_v13  ;;  %v960_v14 = vpop.permute.xlu1 %959  ;;  %v966_v31 = vmul.f32 %v3235_v20, %v962_v44 }
 0xa25   : > { %v965_v16 = vmul.f32 %v4110_v11, %v960_v14  ;;  %3238 = vpow2.f32 %v1799_v41 }
 0xa26   : > { %3240 = vpow2.f32 %v1670_v49 }
 0xa27   : > { %969 = vrot.lane.b32.xlu1 %v965_v16, %s3454_s11 }
 0xa2b   : > { %971 = vrot.lane.b32.xlu1 %v966_v31, %s3454_s11 }
 0xa2e   : > { %v3237_v34 = vpop.eup %3236 }
 0xa2f   : > { %v1806_v22 = vsel %vm1112_vm2, %v3237_v34, 0.0  ;;  %v3239_v9 = vpop.eup %3238 }
 0xa30   : > { %1807 = vadd.xlane.f32.xlu0 %v1806_v22  ;;  %v1803_v33 = vsel %vm1112_vm2, %v3239_v9, 0.0  ;;  %v3241_v48 = vpop.eup %3240 }
 0xa31   : > { %v1675_v23 = vsel %vm1659_vm4, %v3241_v48, 0.0 }
 0xa34   : > { %1804 = vadd.xlane.f32.xlu0 %v1803_v33 }
 0xa4f   : > { %1676 = vadd.xlane.f32.xlu1 %v1675_v23 }
 0xa91   : > { %v1674_v43 = vpop.xlane.xlu0 %1673 }
 0xa99   : > { %v970_v2 = vpop.permute.xlu1 %969 }
 0xa9a   : > { %v975_v10 = vadd.f32 %v970_v2, %v955_v39  ;;  %v4377_v39 = vmov 3   ;;  %v4378_v2 = vmov 2  }
 0xa9c   : > { %3242 = vtanh.f32 %v975_v10 }
 0xa9d   : > { %v972_v53 = vpop.permute.xlu1 %971 }
 0xa9e   : > { %v976_v13 = vadd.f32 %v972_v53, %v956_v12  ;;  %v4379_v53 = vmov 0  }
 0xaa0   : > { %3244 = vtanh.f32 %v976_v13 }
 0xaa1   : > { %3246 = vrcp.f32 %v1674_v43 }
 0xaa6   : > { %v3243_v41 = vpop.eup %3242 }
 0xaa7   : > { %981 = vrot.lane.b32.xlu1 %v3243_v41, %s3453_s23  ;;  %v4381_v41 = vmov 5  }
 0xaaa   : > { %v3245_v17 = vpop.eup %3244 }
 0xaab   : > { %983 = vrot.lane.b32.xlu0 %v3245_v17, %s3453_s23  ;;  %v3247_v15 = vpop.eup %3246 }
 0xaac   : > { %v1680_v14 = vmul.f32 %v3247_v15, %v3227_v21 }
 0xabd   : > { %v1808_v16 = vpop.xlane.xlu0 %1807 }
 0xac1   : > { %v1805_v31 = vpop.xlane.xlu0 %1804 }
 0xaca   : > { %1616 = vadd.xlane.f32.xlu0 %v4107_v19 }
 0xacb   : > { %1614 = vadd.xlane.f32.xlu1 %v4105_v37 }
 0xadc   : > { %v1677_v44 = vpop.xlane.xlu1 %1676  ;;  %1684 = vperm.xlu1 %3092, %v1680_v14  }
 0xadd   : > { %3248 = vrcp.f32 %v1677_v44 }
 0xade   : > { %3250 = vrcp.f32 %v1808_v16 }
 0xadf   : > { %3252 = vrcp.f32 %v1805_v31 }
 0xae0   : > { %3094 = vset.pattern.permute.xlu1 %v4376_v18 }
 0xae1   : > { %1695 = vperm.xlu1 %3094, %v1680_v14  }
 0xae7   : > { %v3249_v22 = vpop.eup %3248 }
 0xae8   : > { %v1681_v33 = vmul.f32 %v3249_v22, %v3241_v48  ;;  %v3251_v35 = vpop.eup %3250 }
 0xae9   : > { %v1812_v49 = vmul.f32 %v3251_v35, %v3237_v34  ;;  %v3253_v23 = vpop.eup %3252 }
 0xaea   : > { %1689 = vperm.xlu0 %3093, %v1681_v33   ;;  %1699 = vperm.xlu1 %3094, %v1681_v33   ;;  %v1811_v21 = vmul.f32 %v3253_v23, %v3239_v9  ;;  %v4380_v9 = vmov 4  }
 0xaee   : > { %3095 = vset.pattern.permute.xlu1 %v4377_v39  ;;  %3097 = vset.pattern.permute.xlu0 %v4376_v18 }
 0xaef   : > { %1850 = vperm.xlu1 %3095, %v1812_v49  }
 0xaf3   : > { %1846 = vperm.xlu1 %3095, %v1811_v21  }
 0xaf7   : > { %3096 = vset.pattern.permute.xlu1 %v4378_v2 }
 0xaf8   : > { %1836 = vperm.xlu1 %3096, %v1811_v21  }
 0xafc   : > { %1840 = vperm.xlu1 %3096, %v1812_v49  }
 0xb00   : > { %3098 = vset.pattern.permute.xlu1 %v4376_v18 }
 0xb19   : > { %v982_v10 = vpop.permute.xlu1 %981 }
 0xb1a   : > { %v987_v48 = vmul.f32 %v4110_v11, %v982_v10 }
 0xb1c   : > { %2127 = vrot.lane.b32.xlu1 %v987_v48, %s3454_s11  ;;  %v2030_v13 = vmul.f32 %v987_v48, %v3781_v27  ;;  %v2014_v11 = vmul.f32 %v987_v48, %v3739_v45 }
 0xb1d   : > { %v984_v34 = vpop.permute.xlu0 %983 }
 0xb1e   : > { %v988_v12 = vmul.f32 %v3235_v20, %v984_v34  ;;  %v2046_v20 = vmul.f32 %v987_v48, %v987_v48 }
 0xb20   : > { %1826 = vperm.xlu1 %3098, %v1811_v21   ;;  %2129 = vrot.lane.b32.xlu0 %v988_v12, %s3454_s11  ;;  %v2015_v17 = vmul.f32 %v988_v12, %v3741_v46  ;;  %v2031_v27 = vmul.f32 %v988_v12, %v3783_v28  ;;  %v2047_v45 = vmul.f32 %v988_v12, %v988_v12 }
 0xb24   : > { %3099 = vset.pattern.permute.xlu1 %v4379_v53  ;;  %1830 = vperm.xlu0 %3097, %v1812_v49  }
 0xb25   : > { %1815 = vperm.xlu1 %3099, %v1811_v21  }
 0xb28   : > { %3101 = vset.pattern.permute.xlu0 %v4380_v9 }
 0xb29   : > { %1820 = vperm.xlu1 %3099, %v1812_v49   ;;  %1860 = vperm.xlu0 %3101, %v1812_v49  }
 0xb2d   : > { %3100 = vset.pattern.permute.xlu1 %v4381_v41  ;;  %2034 = vrot.lane.b32.xlu0 %v2030_v13, %s3454_s11 }
 0xb2e   : > { %1870 = vperm.xlu1 %3100, %v1812_v49   ;;  %3102 = vset.pattern.permute.xlu0 %v4381_v41 }
 0xb31   : > { %1866 = vperm.xlu0 %3102, %v1811_v21  }
 0xb32   : > { %2018 = vrot.lane.b32.xlu1 %v2014_v11, %s3454_s11 }
 0xb33   : > { %3103 = vset.pattern.permute.xlu1 %v4380_v9 }
 0xb35   : > { %2050 = vrot.lane.b32.xlu0 %v2046_v20, %s3454_s11 }
 0xb36   : > { %2020 = vrot.lane.b32.xlu1 %v2015_v17, %s3454_s11  ;;  %3105 = vset.pattern.permute.xlu0 %v4379_v53 }
 0xb3a   : > { %2036 = vrot.lane.b32.xlu1 %v2031_v27, %s3454_s11 }
 0xb3e   : > { %1856 = vperm.xlu1 %3103, %v1811_v21  }
 0xb42   : > { %2052 = vrot.lane.b32.xlu1 %v2047_v45, %s3454_s11 }
 0xb43   : > { %3104 = vset.pattern.permute.xlu1 %v4379_v53 }
 0xb57   : > { %v1617_v43 = vpop.xlane.xlu0 %1616 }
 0xb58   : > { %v1619_v15 = vmax.f32 %v1617_v43, 1e-10  ;;  %v1615_v14 = vpop.xlane.xlu1 %1614 }
 0xb59   : > { %v1618_v46 = vmax.f32 %v1615_v14, 1e-10 }
 0xb5a   : > { %3254 = vrcp.f32 %v1619_v15 }
 0xb5b   : > { %3256 = vrcp.f32 %v1618_v46 }
 0xb5c   : > { %v1685_v16 = vpop.permute.xlu1 %1684 }
 0xb5d   : > { %v1692_v34 = vmul.f32 %v1685_v16, %v3980_v4 }
 0xb60   : > { %v1696_v31 = vpop.permute.xlu1 %1695 }
 0xb64   : > { %v3255_v44 = vpop.eup %3254 }
 0xb65   : > { %v3257_v22 = vpop.eup %3256  ;;  %v4155_v35 = vmul.f32 %v3255_v44, %v4107_v19 }
 0xb66   : > { %v4152_v28 = vmul.f32 %v3257_v22, %v4105_v37 }
 0xb68   : > { %v1702_v10 = vmul.f32 %v1696_v31, %v4152_v28 }
 0xb69   : > { %v1700_v33 = vpop.permute.xlu1 %1699  ;;  %v1690_v49 = vpop.permute.xlu0 %1689 }
 0xb6a   : > { %v1703_v23 = vmul.f32 %v1700_v33, %v4155_v35  ;;  %v1693_v21 = vmul.f32 %v1690_v49, %v3977_v3  ;;  %v4163_v13 = vadd.f32 %v1702_v10, %v1692_v34  ;;  %v4385_v10 = vld [vmem:[#allocation26_spill] sm:$0xff]  ;;  %v3285_v34 = vld [vmem:[#allocation7 + $0x88] sm:$0xff]  }
 0xb6c   : > { %v4161_v12 = vadd.f32 %v1703_v23, %v1693_v21 }
 0xb6e   : > { %v1851_v48 = vpop.permute.xlu1 %1850 }
 0xb6f   : > { %v1854_v11 = vmul.f32 %v1851_v48, %v4161_v12  ;;  %v3284_v48 = vld [vmem:[#allocation7 + $0xc8] sm:$0xff]  }
 0xb72   : > { %v1847_v37 = vpop.permute.xlu1 %1846 }
 0xb73   : > { %v1853_v19 = vmul.f32 %v1847_v37, %v4163_v13  ;;  %v3291_v37 = vld [vmem:[#allocation7 + $0xa0] sm:$0xff]  }
 0xb75   : > { %v1878_v20 = vpack.c.bf16 %v1854_v11, %v1853_v19  ;;  %v3292_v11 = vld [vmem:[#allocation7 + $0xe8] sm:$0xff]  }
 0xb76   : > { %v3293_v19 = vld [vmem:[#allocation7 + $0xa8] sm:$0xff]  }
 0xb77   : > { %v1837_v17 = vpop.permute.xlu1 %1836  ;;  %1954 = vmatprep.mubr.bf16.mxu1 %v1878_v20  ;;  %v4386_v20 = vld [vmem:[#allocation19_spill] sm:$0xff] }
 0xb78   : > { %v1843_v3 = vmul.f32 %v1837_v17, %v4163_v13  ;;  %v4387_v17 = vld [vmem:[#allocation20_spill] sm:$0xff] }
 0xb7b   : > { %v1841_v27 = vpop.permute.xlu1 %1840 }
 0xb7c   : > { %v1844_v45 = vmul.f32 %v1841_v27, %v4161_v12  ;;  %v4388_v27 = vld [vmem:[#allocation21_spill] sm:$0xff] }
 0xb7e   : > { %v1877_v43 = vpack.c.bf16 %v1844_v45, %v1843_v3  ;;  %v4389_v3 = vld [vmem:[#allocation22_spill] sm:$0xff] }
 0xb80   : > { %1955 = vmatmul.mubr.bf16.vlgmr.msra.gmra.mrb[16].mxu1 %v1877_v43 }
 0xb81   : > { %2987 = vmatpush3.bf16.msra.mxu1 %v3777_v24 }
 0xb82   : > { %2989 = vmatprep.subr.bf16.mxu1 %v3796_v32 }
 0xb85   : > { %2991 = vmatpush3.bf16.msra.mxu1 %v3796_v32 }
 0xb86   : > { %2821 = vmatprep.subr.bf16.mxu1 %v3874_v36 }
 0xb8e   : > { %v2128_v4 = vpop.permute.xlu1 %2127 }
 0xb8f   : > { %2965 = vmatprep.mubr.msk.f32.mxu1 %vm527_vm1, %v2128_v4 }
 0xb92   : > { %v2130_v15 = vpop.permute.xlu0 %2129 }
 0xb93   : > { %2966 = vmatmul.mubr.msk.f32.vlgmr.msra.gmra.mrb[20].mxu1 %vm527_vm1, %v2130_v15 }
 0xb94   : > { %2822 = vmatpush3.bf16.msra.mxu1 %v3879_v38 }
 0xb95   : > { %2823 = vmatprep.subr.bf16.mxu1 %v3888_v42 }
 0xb98   : > { %2824 = vmatpush3.bf16.msra.mxu1 %v3894_v47 }
 0xb99   : > { %2825 = vmatprep.subr.bf16.mxu1 %v3904_v51 }
 0xb9c   : > { %2826 = vmatpush3.bf16.msra.mxu1 %v3910_v52 }
 0xb9d   : > { %2827 = vmatprep.subr.bf16.mxu1 %v3916_v54 }
 0xb9f   : > { %v1827_v24 = vpop.permute.xlu1 %1826 }
 0xba0   : > { %2828 = vmatpush3.bf16.msra.mxu1 %v3918_v55  ;;  %v1833_v36 = vmul.f32 %v1827_v24, %v4163_v13 }
 0xba1   : > { %2829 = vmatprep.subr.bf16.mxu1 %v3924_v56 }
 0xba3   : > { %v1831_v32 = vpop.permute.xlu0 %1830 }
 0xba4   : > { %v1834_v38 = vmul.f32 %v1831_v32, %v4161_v12  ;;  %v1816_v14 = vpop.permute.xlu1 %1815  ;;  %2830 = vmatpush3.bf16.msra.mxu1 %v3927_v57 }
 0xba5   : > { %2831 = vmatprep.subr.bf16.mxu1 %v3931_v58  ;;  %v1823_v52 = vmul.f32 %v1816_v14, %v4163_v13 }
 0xba6   : > { %v1876_v42 = vpack.c.bf16 %v1834_v38, %v1833_v36 }
 0xba8   : > { %v1821_v47 = vpop.permute.xlu1 %1820  ;;  %1913 = vmatprep.mubr.bf16.mxu0 %v1876_v42  ;;  %v1861_v51 = vpop.permute.xlu0 %1860  ;;  %2832 = vmatpush3.bf16.msra.mxu1 %v3934_v59 }
 0xba9   : > { %v1824_v54 = vmul.f32 %v1821_v47, %v4161_v12  ;;  %2833 = vmatprep.subr.bf16.mxu1 %v3938_v60 }
 0xbab   : > { %v1875_v55 = vpack.c.bf16 %v1824_v54, %v1823_v52 }
 0xbac   : > { %v2035_v56 = vpop.permute.xlu0 %2034  ;;  %2834 = vmatpush3.bf16.msra.mxu1 %v3942_v61 }
 0xbad   : > { %v1871_v46 = vpop.permute.xlu1 %1870  ;;  %1914 = vmatmul.mubr.bf16.vlgmr.msra.gmra.mrb[24].mxu0 %v1875_v55  ;;  %2835 = vmatprep.subr.bf16.mxu1 %v3945_v62  ;;  %v4382_v62 = vld [vmem:[#allocation23_spill] sm:$0xff]  ;;  %v2040_v44 = vsel %vm527_vm1, %v2035_v56, 0.0 }
 0xbae   : > { %2794 = vmatpush3.bf16.msra.mxu0 %v4009_v1  ;;  %v1874_v58 = vmul.f32 %v1871_v46, %v4161_v12 }
 0xbaf   : > { %2795 = vmatprep.subr.bf16.mxu0 %v4012_v5 }
 0xbb0   : > { %v1867_v57 = vpop.permute.xlu0 %1866  ;;  %2836 = vmatpush3.bf16.msra.mxu1 %v3949_v63  ;;  %v4383_v63 = vld [vmem:[#allocation24_spill] sm:$0xff] }
 0xbb1   : > { %v1873_v59 = vmul.f32 %v1867_v57, %v4163_v13  ;;  %v2019_v60 = vpop.permute.xlu1 %2018  ;;  %2865 = vmatprep.subr.bf16.mxu1 %v3953_v0  ;;  %v4384_v0 = vld [vmem:[#allocation25_spill] sm:$0xff] }
 0xbb2   : > { %2796 = vmatpush3.bf16.msra.mxu0 %v4018_v25  ;;  %v2024_v61 = vsel %vm527_vm1, %v2019_v60, 0.0 }
 0xbb3   : > { %v1880_v16 = vpack.c.bf16 %v1874_v58, %v1873_v59  ;;  %2025 = vadd.xlane.f32.xlu0 %v2024_v61  ;;  %2797 = vmatprep.subr.bf16.mxu0 %v4382_v62  ;;  %v3294_v59 = vld [vmem:[%s4320_s5] ss:$0 sm:$0xff] }
 0xbb4   : > { %v2051_v31 = vpop.permute.xlu0 %2050 }
 0xbb5   : > { %v2021_v1 = vpop.permute.xlu1 %2020  ;;  %1995 = vmatprep.mubr.bf16.mxu0 %v1880_v16  ;;  %v2056_v22 = vsel %vm527_vm1, %v2051_v31, 0.0 }
 0xbb6   : > { %v2027_v5 = vsel %vm527_vm1, %v2021_v1, 0.0  ;;  %2798 = vmatpush3.bf16.msra.mxu0 %v4383_v63 }
 0xbb7   : > { %2028 = vadd.xlane.f32.xlu1 %v2027_v5  ;;  %2041 = vadd.xlane.f32.xlu0 %v2040_v44 }
 0xbb8   : > { %2799 = vmatprep.subr.bf16.mxu0 %v4384_v0 }
 0xbb9   : > { %v2037_v25 = vpop.permute.xlu1 %2036 }
 0xbba   : > { %2800 = vmatpush3.bf16.msra.mxu0 %v4037_v30  ;;  %v2043_v33 = vsel %vm527_vm1, %v2037_v25, 0.0 }
 0xbbb   : > { %2044 = vadd.xlane.f32.xlu0 %v2043_v33  ;;  %2057 = vadd.xlane.f32.xlu1 %v2056_v22 }
 0xbbc   : > { %2801 = vmatprep.subr.bf16.mxu0 %v4040_v50  ;;  %v1864_v50 = vmul.f32 %v1861_v51, %v4161_v12  ;;  %v3290_v12 = vld [vmem:[#allocation7 + $0xe0] sm:$0xff]  }
 0xbbd   : > { %v1857_v49 = vpop.permute.xlu1 %1856 }
 0xbbe   : > { %2802 = vmatpush3.bf16.msra.mxu0 %v4047_v8  ;;  %v1863_v30 = vmul.f32 %v1857_v49, %v4163_v13  ;;  %v3288_v13 = vld [vmem:[#allocation7 + $0xd8] sm:$0xff]  }
 0xbbf   : > { %2803 = vmatprep.subr.bf16.mxu0 %v4051_v40  ;;  %v3282_v40 = vld [vmem:[#allocation7 + $0xc0] sm:$0xff]  }
 0xbc0   : > { %v1879_v8 = vpack.c.bf16 %v1864_v50, %v1863_v30 }
 0xbc1   : > { %v2053_v23 = vpop.permute.xlu1 %2052 }
 0xbc2   : > { %2804 = vmatpush3.bf16.msra.mxu0 %v4055_v29  ;;  %v2059_v21 = vsel %vm527_vm1, %v2053_v23, 0.0  ;;  %v3283_v29 = vld [vmem:[#allocation7 + $0x80] sm:$0xff]  }
 0xbc3   : > { %2060 = vadd.xlane.f32.xlu0 %v2059_v21  ;;  %2805 = vmatprep.subr.bf16.mxu0 %v4058_v6  ;;  %v3286_v6 = vld [vmem:[#allocation7 + $0xd0] sm:$0xff]  }
 0xbc6   : > { %2806 = vmatpush3.bf16.msra.mxu0 %v4061_v7  ;;  %v3287_v7 = vld [vmem:[#allocation7 + $0x90] sm:$0xff]  }
 0xbc7   : > { %2807 = vmatprep.subr.bf16.mxu0 %v4064_v26  ;;  %v3289_v26 = vld [vmem:[#allocation7 + $0x98] sm:$0xff]  }
 0xbca   : > { %2808 = vmatpush3.bf16.msra.mxu0 %v4385_v10 }
 0xbcb   : > { %2843 = vmatprep.subr.bf16.mxu0 %v3282_v40 }
 0xbcd   : > { %1996 = vmatmul.mubr.bf16.vlgmr.msra.gmra.mrb[28].mxu0 %v1879_v8 }
 0xbce   : > { %2844 = vmatpush3.bf16.msra.mxu0 %v3283_v29 }
 0xbcf   : > { %2845 = vmatprep.subr.bf16.mxu0 %v3284_v48 }
 0xbd2   : > { %2846 = vmatpush3.bf16.msra.mxu0 %v3285_v34 }
 0xbd3   : > { %2847 = vmatprep.subr.bf16.mxu0 %v3286_v6 }
 0xbd6   : > { %2848 = vmatpush3.bf16.msra.mxu0 %v3287_v7 }
 0xbd7   : > { %2849 = vmatprep.subr.bf16.mxu0 %v3288_v13 }
 0xbda   : > { %2850 = vmatpush3.bf16.msra.mxu0 %v3289_v26 }
 0xbdb   : > { %2851 = vmatprep.subr.bf16.mxu0 %v3290_v12 }
 0xbde   : > { %2852 = vmatpush3.bf16.msra.mxu0 %v3291_v37 }
 0xbdf   : > { %2853 = vmatprep.subr.bf16.mxu0 %v3292_v11 }
 0xbe2   : > { %2854 = vmatpush3.bf16.msra.mxu0 %v3293_v19 }
 0xbe3   : > { %2855 = vmatprep.subr.bf16.mxu0 %v4386_v20 }
 0xbe6   : > { %2856 = vmatpush3.bf16.msra.mxu0 %v4387_v17 }
 0xbe7   : > { %2857 = vmatprep.subr.bf16.mxu0 %v4388_v27 }
 0xbea   : > { %2858 = vmatpush3.bf16.msra.mxu0 %v4389_v3 }
 0xc40   : > { %v2026_v45 = vpop.xlane.xlu0 %2025 }
 0xc44   : > { %v2029_v43 = vpop.xlane.xlu1 %2028  ;;  %v2042_v4 = vpop.xlane.xlu0 %2041 }
 0xc45   : > { %v2062_v15 = vsel %vm1656_vm3, %v2026_v45, %v2042_v4 }
 0xc48   : > { %v2058_v24 = vpop.xlane.xlu1 %2057  ;;  %v2045_v38 = vpop.xlane.xlu0 %2044 }
 0xc49   : > { %v2064_v32 = vsel %vm1659_vm4, %v2062_v15, %v2058_v24  ;;  %v2063_v14 = vsel %vm1656_vm3, %v2029_v43, %v2045_v38 }
 0xc4a   : > { %v2067_v36 = vsel %vm2066_vm5, %v2064_v32, -inf }
 0xc4b   : > { %2068 = vmax.xlane.f32.xlu1 %v2067_v36 }
 0xc50   : > { %v2061_v42 = vpop.xlane.xlu0 %2060 }
 0xc51   : > { %v2065_v47 = vsel %vm1659_vm4, %v2063_v14, %v2061_v42 }
 0xc52   : > { %v2070_v51 = vsel %vm2066_vm5, %v2065_v47, -inf }
 0xc53   : > { %v2787_v52 = vpop.f32.mrb[16].mxu1  ;;  %2071 = vmax.xlane.f32.xlu0 %v2070_v51 }
 0xc54   : > { %v2788_v54 = vpop.f32.mrb[17].mxu1 }
 0xc55   : > { %v2789_v55 = vadd.f32 %v2788_v54, %v2787_v52  ;;  %v2790_v56 = vpop.f32.mrb[18].mxu1 }
 0xc56   : > { %v2791_v46 = vpop.f32.mrb[19].mxu1 }
 0xc57   : > { %v2792_v57 = vadd.f32 %v2791_v46, %v2790_v56 }
 0xc66   : > { %v2967_v58 = vpop.f32.mrb[20].mxu1 }
 0xc67   : > { %v2207_v60 = vadd.f32 %v3294_v59, %v2967_v58  ;;  %v2201_v61 = vpop.f32.mrb[21].mxu1 }
 0xc68   : > { %v2202_v16 = vadd.f32 %v3294_v59, %v2201_v61 }
 0xc69   : > { %v2213_v62 = vsel %vm1112_vm2, %v2207_v60, -inf }
 0xc6a   : > { %2214 = vmax.xlane.f32.xlu0 %v2213_v62  ;;  %v2210_v1 = vsel %vm1112_vm2, %v2202_v16, -inf }
 0xc6b   : > { %2211 = vmax.xlane.f32.xlu1 %v2210_v1 }
 0xc80   : > { %v2765_v5 = vpop.f32.mrb[24].mxu0 }
 0xc81   : > { %v2766_v63 = vpop.f32.mrb[25].mxu0 }
 0xc82   : > { %v2767_v44 = vadd.f32 %v2766_v63, %v2765_v5  ;;  %v2768_v31 = vpop.f32.mrb[26].mxu0  ;;  %v3295_v5 = vld [vmem:[%s3974_s10 + $0x8] sm:$0xff] }
 0xc83   : > { %v2769_v0 = vpop.f32.mrb[27].mxu0 }
 0xc84   : > { %v1957_v25 = vadd.f32 %v2789_v55, %v2767_v44  ;;  %v2770_v22 = vadd.f32 %v2769_v0, %v2768_v31  ;;  %v3296_v0 = vld [vmem:[%s3974_s10] sm:$0xff] }
 0xc86   : > { %v1960_v33 = vadd.f32 %v2792_v57, %v2770_v22 }
 0xca0   : > { %v2809_v49 = vpop.f32.mrb[28].mxu0 }
 0xca1   : > { %v2810_v23 = vpop.f32.mrb[29].mxu0 }
 0xca2   : > { %v2811_v21 = vadd.f32 %v2810_v23, %v2809_v49  ;;  %v2812_v30 = vpop.f32.mrb[30].mxu0 }
 0xca3   : > { %v2813_v50 = vpop.f32.mrb[31].mxu0 }
 0xca4   : > { %v4235_v10 = vadd.f32 %v2811_v21, %v1957_v25  ;;  %v2814_v8 = vadd.f32 %v2813_v50, %v2812_v30 }
 0xca6   : > { %v4237_v40 = vadd.f32 %v2814_v8, %v1960_v33 }
 0xcd8   : > { %v2069_v29 = vpop.xlane.xlu1 %2068 }
 0xcd9   : > { %v2073_v48 = vsub.f32 %v2064_v32, %v2069_v29 }
 0xcdb   : > { %v2075_v34 = vmul.f32 1.442695, %v2073_v48 }
 0xcdd   : > { %3258 = vpow2.f32 %v2075_v34 }
 0xce0   : > { %v2072_v6 = vpop.xlane.xlu0 %2071 }
 0xce1   : > { %v2074_v7 = vsub.f32 %v2065_v47, %v2072_v6 }
 0xce3   : > { %v2077_v13 = vmul.f32 1.442695, %v2074_v7 }
 0xce5   : > { %3260 = vpow2.f32 %v2077_v13 }
 0xce7   : > { %v3259_v26 = vpop.eup %3258 }
 0xce8   : > { %v2079_v12 = vsel %vm2066_vm5, %v3259_v26, 0.0 }
 0xce9   : > { %2080 = vadd.xlane.f32.xlu1 %v2079_v12 }
 0xcef   : > { %v3261_v37 = vpop.eup %3260 }
 0xcf0   : > { %v2082_v11 = vsel %vm2066_vm5, %v3261_v37, 0.0 }
 0xcf1   : > { %2083 = vadd.xlane.f32.xlu0 %v2082_v11  ;;  %v3297_v11 = vld [vmem:[#allocation7 + $0x100] sm:$0xff]  }
 0xcf7   : > { %v2215_v19 = vpop.xlane.xlu0 %2214 }
 0xcf8   : > { %v2217_v20 = vsub.f32 %v2207_v60, %v2215_v19  ;;  %v2212_v17 = vpop.xlane.xlu1 %2211  ;;  %v3298_v19 = vld [vmem:[#allocation7 + $0x148] sm:$0xff]  }
 0xcf9   : > { %v2216_v27 = vsub.f32 %v2202_v16, %v2212_v17  ;;  %v3299_v17 = vld [vmem:[#allocation7 + $0x108] sm:$0xff]  }
 0xcfa   : > { %v2220_v3 = vmul.f32 1.442695, %v2217_v20 }
 0xcfb   : > { %v2218_v45 = vmul.f32 1.442695, %v2216_v27 }
 0xcfc   : > { %3262 = vpow2.f32 %v2220_v3  ;;  %v3300_v3 = vld [vmem:[#allocation7 + $0x150] sm:$0xff]  }
 0xcfd   : > { %3264 = vpow2.f32 %v2218_v45  ;;  %v3301_v45 = vld [vmem:[#allocation7 + $0x110] sm:$0xff]  }
 0xd06   : > { %v3263_v43 = vpop.eup %3262 }
 0xd07   : > { %v3265_v4 = vpop.eup %3264  ;;  %v2225_v15 = vsel %vm1112_vm2, %v3263_v43, 0.0 }
 0xd08   : > { %2226 = vadd.xlane.f32.xlu0 %v2225_v15  ;;  %v2222_v24 = vsel %vm1112_vm2, %v3265_v4, 0.0 }
 0xd09   : > { %2223 = vadd.xlane.f32.xlu1 %v2222_v24 }
 0xd0c   : > { %2006 = vadd.xlane.f32.xlu0 %v4237_v40 }
 0xd0d   : > { %2004 = vadd.xlane.f32.xlu1 %v4235_v10 }
 0xd76   : > { %v2081_v32 = vpop.xlane.xlu1 %2080 }
 0xd77   : > { %3266 = vrcp.f32 %v2081_v32 }
 0xd7e   : > { %v2084_v36 = vpop.xlane.xlu0 %2083 }
 0xd7f   : > { %3268 = vrcp.f32 %v2084_v36  ;;  %v3303_v36 = vld [vmem:[#allocation7 + $0x118] sm:$0xff]  }
 0xd81   : > { %v3267_v38 = vpop.eup %3266 }
 0xd82   : > { %v2087_v14 = vmul.f32 %v3267_v38, %v3259_v26  ;;  %v3304_v38 = vld [vmem:[#allocation7 + $0x160] sm:$0xff]  }
 0xd84   : > { %2091 = vperm.xlu1 %3104, %v2087_v14  }
 0xd88   : > { %3106 = vset.pattern.permute.xlu1 %v4376_v18 }
 0xd89   : > { %v3269_v42 = vpop.eup %3268  ;;  %2102 = vperm.xlu1 %3106, %v2087_v14  }
 0xd8a   : > { %v2088_v47 = vmul.f32 %v3269_v42, %v3261_v37 }
 0xd8c   : > { %2096 = vperm.xlu0 %3105, %v2088_v47  }
 0xd8d   : > { %2106 = vperm.xlu1 %3106, %v2088_v47  }
 0xd90   : > { %3111 = vset.pattern.permute.xlu0 %v4378_v2 }
 0xd91   : > { %3107 = vset.pattern.permute.xlu1 %v4378_v2 }
 0xd92   : > { %2114 = vperm.xlu1 %3107, %v2087_v14  }
 0xd95   : > { %v2227_v51 = vpop.xlane.xlu0 %2226 }
 0xd96   : > { %3270 = vrcp.f32 %v2227_v51  ;;  %v2224_v52 = vpop.xlane.xlu1 %2223  ;;  %2118 = vperm.xlu1 %3107, %v2088_v47   ;;  %v3305_v51 = vld [vmem:[#allocation7 + $0x120] sm:$0xff]  }
 0xd97   : > { %3272 = vrcp.f32 %v2224_v52 }
 0xd99   : > { %v2007_v57 = vpop.xlane.xlu0 %2006 }
 0xd9a   : > { %3108 = vset.pattern.permute.xlu1 %v4376_v18  ;;  %v2005_v18 = vpop.xlane.xlu1 %2004  ;;  %v2009_v59 = vmax.f32 %v2007_v57, 1e-10 }
 0xd9c   : > { %3274 = vrcp.f32 %v2009_v59 }
 0xda0   : > { %v3271_v54 = vpop.eup %3270 }
 0xda1   : > { %v2231_v55 = vmul.f32 %v3271_v54, %v3263_v43  ;;  %v3273_v56 = vpop.eup %3272  ;;  %v3306_v54 = vld [vmem:[#allocation7 + $0x168] sm:$0xff]  }
 0xda2   : > { %v2230_v46 = vmul.f32 %v3273_v56, %v3265_v4  ;;  %v3302_v4 = vld [vmem:[#allocation7 + $0x158] sm:$0xff]   ;;  %v3308_v56 = vld [vmem:[#allocation7 + $0x170] sm:$0xff]  }
 0xda3   : > { %2259 = vperm.xlu0 %3111, %v2231_v55   ;;  %2249 = vperm.xlu1 %3108, %v2231_v55  }
 0xda7   : > { %3113 = vset.pattern.permute.xlu0 %v4377_v39  ;;  %2245 = vperm.xlu1 %3108, %v2230_v46  }
 0xda8   : > { %2265 = vperm.xlu0 %3113, %v2230_v46  }
 0xdab   : > { %3109 = vset.pattern.permute.xlu1 %v4379_v53 }
 0xdac   : > { %3116 = vset.pattern.permute.xlu0 %v4380_v9  ;;  %2234 = vperm.xlu1 %3109, %v2230_v46  }
 0xdad   : > { %2275 = vperm.xlu0 %3116, %v2230_v46  }
 0xdb0   : > { %2239 = vperm.xlu1 %3109, %v2231_v55  }
 0xdb1   : > { %3118 = vset.pattern.permute.xlu0 %v4381_v41 }
 0xdb4   : > { %3110 = vset.pattern.permute.xlu1 %v4377_v39  ;;  %v2008_v39 = vmax.f32 %v2005_v18, 1e-10 }
 0xdb5   : > { %2269 = vperm.xlu1 %3110, %v2231_v55  }
 0xdb6   : > { %3276 = vrcp.f32 %v2008_v39  ;;  %v3311_v39 = vld [vmem:[#allocation7 + $0x138] sm:$0xff]  }
 0xdb9   : > { %3112 = vset.pattern.permute.xlu1 %v4381_v41 }
 0xdba   : > { %2289 = vperm.xlu1 %3112, %v2231_v55  }
 0xdbe   : > { %3114 = vset.pattern.permute.xlu1 %v4378_v2  ;;  %v3275_v2 = vpop.eup %3274 }
 0xdbf   : > { %2255 = vperm.xlu1 %3114, %v2230_v46   ;;  %v2013_v1 = vmul.f32 %v3275_v2, %v4237_v40 }
 0xdc0   : > { %v3277_v16 = vpop.eup %3276 }
 0xdc1   : > { %v2011_v31 = vmul.f32 %v3277_v16, %v4235_v10 }
 0xdc3   : > { %3115 = vset.pattern.permute.xlu1 %v4381_v41 }
 0xdc4   : > { %2285 = vperm.xlu1 %3115, %v2230_v46  }
 0xdc8   : > { %3117 = vset.pattern.permute.xlu1 %v4380_v9 }
 0xdc9   : > { %2279 = vperm.xlu1 %3117, %v2231_v55   ;;  %v3307_v55 = vld [vmem:[#allocation7 + $0x128] sm:$0xff]  }
 0xe03   : > { %v2092_v53 = vpop.permute.xlu1 %2091 }
 0xe04   : > { %v2099_v25 = vmul.f32 %v3296_v0, %v2092_v53  ;;  %v3309_v53 = vld [vmem:[#allocation7 + $0x130] sm:$0xff]  }
 0xe08   : > { %v2103_v58 = vpop.permute.xlu1 %2102 }
 0xe09   : > { %v2109_v9 = vmul.f32 %v2103_v58, %v4152_v28  ;;  %v3310_v58 = vld [vmem:[#allocation7 + $0x178] sm:$0xff]  }
 0xe0b   : > { %v2097_v62 = vpop.permute.xlu0 %2096  ;;  %v2111_v23 = vadd.f32 %v2109_v9, %v2099_v25 }
 0xe0c   : > { %v2107_v60 = vpop.permute.xlu1 %2106  ;;  %v2100_v63 = vmul.f32 %v3295_v5, %v2097_v62 }
 0xe0d   : > { %v2110_v44 = vmul.f32 %v2107_v60, %v4155_v35 }
 0xe0f   : > { %v2112_v21 = vadd.f32 %v2110_v44, %v2100_v63 }
 0xe11   : > { %v2115_v61 = vpop.permute.xlu1 %2114 }
 0xe12   : > { %v2121_v22 = vmul.f32 %v2115_v61, %v2011_v31 }
 0xe14   : > { %v2123_v30 = vadd.f32 %v2121_v22, %v2111_v23 }
 0xe15   : > { %v2119_v41 = vpop.permute.xlu1 %2118 }
 0xe16   : > { %v2122_v33 = vmul.f32 %v2119_v41, %v2013_v1 }
 0xe18   : > { %v2124_v50 = vadd.f32 %v2122_v33, %v2112_v21 }
 0xe22   : > { %v2250_v49 = vpop.permute.xlu1 %2249  ;;  %v2260_v34 = vpop.permute.xlu0 %2259 }
 0xe23   : > { %v2253_v29 = vmul.f32 %v2250_v49, %v2124_v50  ;;  %v2263_v15 = vmul.f32 %v2260_v34, %v2124_v50 }
 0xe26   : > { %v2246_v8 = vpop.permute.xlu1 %2245 }
 0xe27   : > { %v2252_v40 = vmul.f32 %v2246_v8, %v2123_v30  ;;  %v2266_v10 = vpop.permute.xlu0 %2265 }
 0xe28   : > { %v2272_v12 = vmul.f32 %v2266_v10, %v2123_v30 }
 0xe29   : > { %v2295_v48 = vpack.c.bf16 %v2253_v29, %v2252_v40 }
 0xe2b   : > { %v2235_v28 = vpop.permute.xlu1 %2234  ;;  %2332 = vmatprep.mubr.bf16.mxu1 %v2295_v48 }
 0xe2c   : > { %v2242_v35 = vmul.f32 %v2235_v28, %v2123_v30  ;;  %v2276_v18 = vpop.permute.xlu0 %2275 }
 0xe2d   : > { %v2282_v59 = vmul.f32 %v2276_v18, %v2123_v30 }
 0xe2f   : > { %v2240_v6 = vpop.permute.xlu1 %2239 }
 0xe30   : > { %v2243_v7 = vmul.f32 %v2240_v6, %v2124_v50 }
 0xe32   : > { %v2294_v13 = vpack.c.bf16 %v2243_v7, %v2242_v35 }
 0xe34   : > { %v2270_v26 = vpop.permute.xlu1 %2269  ;;  %2333 = vmatmul.mubr.bf16.vlgmr.msra.gmra.mrb[24].mxu1 %v2294_v13 }
 0xe35   : > { %v2273_v37 = vmul.f32 %v2270_v26, %v2124_v50  ;;  %2866 = vmatpush3.bf16.msra.mxu1 %v3297_v11 }
 0xe36   : > { %2867 = vmatprep.subr.bf16.mxu1 %v3298_v19 }
 0xe37   : > { %v2297_v20 = vpack.c.bf16 %v2273_v37, %v2272_v12 }
 0xe39   : > { %2868 = vmatpush3.bf16.msra.mxu1 %v3299_v17  ;;  %v2290_v27 = vpop.permute.xlu1 %2289  ;;  %2373 = vmatprep.mubr.bf16.mxu0 %v2297_v20 }
 0xe3a   : > { %2869 = vmatprep.subr.bf16.mxu1 %v3300_v3  ;;  %v2293_v42 = vmul.f32 %v2290_v27, %v2124_v50 }
 0xe3d   : > { %2870 = vmatpush3.bf16.msra.mxu1 %v3301_v45 }
 0xe3e   : > { %v2256_v43 = vpop.permute.xlu1 %2255  ;;  %2871 = vmatprep.subr.bf16.mxu1 %v3302_v4 }
 0xe3f   : > { %v2262_v24 = vmul.f32 %v2256_v43, %v2123_v30 }
 0xe41   : > { %v2296_v32 = vpack.c.bf16 %v2263_v15, %v2262_v24  ;;  %2872 = vmatpush3.bf16.msra.mxu1 %v3303_v36 }
 0xe42   : > { %2873 = vmatprep.subr.bf16.mxu1 %v3304_v38 }
 0xe43   : > { %v2286_v14 = vpop.permute.xlu1 %2285  ;;  %2374 = vmatmul.mubr.bf16.vlgmr.msra.gmra.mrb[32].mxu0 %v2296_v32 }
 0xe44   : > { %v2292_v47 = vmul.f32 %v2286_v14, %v2123_v30 }
 0xe45   : > { %2874 = vmatpush3.bf16.msra.mxu1 %v3305_v51 }
 0xe46   : > { %v2299_v52 = vpack.c.bf16 %v2293_v42, %v2292_v47  ;;  %2875 = vmatprep.subr.bf16.mxu1 %v3306_v54 }
 0xe48   : > { %2414 = vmatprep.mubr.bf16.mxu1 %v2299_v52  ;;  %v2280_v46 = vpop.permute.xlu1 %2279 }
 0xe49   : > { %2876 = vmatpush3.bf16.msra.mxu1 %v3307_v55  ;;  %v2283_v57 = vmul.f32 %v2280_v46, %v2124_v50 }
 0xe4a   : > { %2877 = vmatprep.subr.bf16.mxu1 %v3308_v56 }
 0xe4b   : > { %v2298_v60 = vpack.c.bf16 %v2283_v57, %v2282_v59 }
 0xe4d   : > { %2878 = vmatpush3.bf16.msra.mxu1 %v3309_v53 }
 0xe4e   : > { %2879 = vmatprep.subr.bf16.mxu1 %v3310_v58 }
 0xe51   : > { %2880 = vmatpush3.bf16.msra.mxu1 %v3311_v39 }
 0xe54   : > { %2415 = vmatmul.mubr.bf16.vlgmr.msra.gmra.mrb[28].mxu1 %v2298_v60 }
 0xf07   : > { %v2837_v61 = vpop.f32.mrb[24].mxu1 }
 0xf08   : > { %v2838_v2 = vpop.f32.mrb[25].mxu1 }
 0xf09   : > { %v2839_v16 = vadd.f32 %v2838_v2, %v2837_v61  ;;  %v2840_v62 = vpop.f32.mrb[26].mxu1 }
 0xf0a   : > { %v2841_v41 = vpop.f32.mrb[27].mxu1 }
 0xf0b   : > { %v2842_v1 = vadd.f32 %v2841_v41, %v2840_v62 }
 0xf16   : > { %v2859_v9 = vpop.f32.mrb[32].mxu0 }
 0xf17   : > { %v2860_v5 = vpop.f32.mrb[33].mxu0 }
 0xf18   : > { %v2861_v63 = vadd.f32 %v2860_v5, %v2859_v9  ;;  %v2862_v44 = vpop.f32.mrb[34].mxu0 }
 0xf19   : > { %v2863_v31 = vpop.f32.mrb[35].mxu0 }
 0xf1a   : > { %v2376_v0 = vadd.f32 %v2861_v63, %v2839_v16  ;;  %v2864_v25 = vadd.f32 %v2863_v31, %v2862_v44 }
 0xf1c   : > { %v2379_v22 = vadd.f32 %v2864_v25, %v2842_v1 }
 0xf27   : > { %v2881_v33 = vpop.f32.mrb[28].mxu1 }
 0xf28   : > { %v2882_v49 = vpop.f32.mrb[29].mxu1 }
 0xf29   : > { %v2883_v23 = vadd.f32 %v2882_v49, %v2881_v33  ;;  %v2884_v21 = vpop.f32.mrb[30].mxu1 }
 0xf2a   : > { %v2885_v30 = vpop.f32.mrb[31].mxu1 }
 0xf2b   : > { %v2417_v50 = vadd.f32 %v2883_v23, %v2376_v0  ;;  %v2886_v8 = vadd.f32 %v2885_v30, %v2884_v21 }
 0xf2d   : > { %2423 = vadd.xlane.f32.xlu1 %v2417_v50  ;;  %v2420_v29 = vadd.f32 %v2886_v8, %v2379_v22 }
 0xf2f   : > { %2425 = vadd.xlane.f32.xlu0 %v2420_v29 }
 0xfba   : > { %v2424_v40 = vpop.xlane.xlu1 %2423 }
 0xfbb   : > { %v2427_v48 = vmax.f32 %v2424_v40, 1e-10 }
 0xfbc   : > { %v2426_v28 = vpop.xlane.xlu0 %2425 }
 0xfbd   : > { %3278 = vrcp.f32 %v2427_v48  ;;  %v2428_v34 = vmax.f32 %v2426_v28, 1e-10 }
 0xfbf   : > { %3280 = vrcp.f32 %v2428_v34 }
 0xfc7   : > { %v3279_v6 = vpop.eup %3278 }
 0xfc8   : > { %v2430_v35 = vmul.f32 %v3279_v6, %v2417_v50 }
 0xfc9   : > { %v3281_v7 = vpop.eup %3280 }
 0xfca   : > { %v2432_v10 = vmul.f32 %v3281_v7, %v2420_v29  ;;  %2433 = vst [vmem:[%s393_s14] sm:$0xff] %v2430_v35 }
 0xfcc   : > { %2434 = vst [vmem:[%s393_s14 + $0x8] sm:$0xff] %v2432_v10 }
 0xfcd   : > { %3381 = shalt.err (!%p3378_p3)
}
 0xfce   : > { %s3382_s12 = scalar_lea.hbm %s4269_s27, 256  ;;  %s3386_s23 = scalar_lea.hbm %s4323_s8, 512 }
 0xfcf   : > { %p3383_p2 = scmp.ne.s32.totalorder %s4269_s27, %s3382_s12  ;;  %p3387_p11 = scmp.lt.u32.totalorder %s4269_s27, %s4323_s8 }
 0xfd0   : > { %p3388_p12 = scmp.lt.u32.totalorder %s3386_s23, %s3382_s12  ;;  %p3390_p7 = scmp.lt.u32.totalorder %s3382_s12, %s4269_s27 }
 0xfd1   : > { %p3384_p5 = pnand %p3383_p2, %p4390_p0 }
 0xfd2   : > { %p3389_p13 = por %p3388_p12, %p3387_p11 }
 0xfd3   : > { %p3385_p6 = pneg %p3384_p5 }
 0xfd4   : > { %p3391_p8 = por %p3390_p7, %p3389_p13 }
 0xfd6   : > { %p3392_p9 = pnand %p3391_p8, %p3385_p6 }
 0xfd8   : > { %3395 = shalt.err (!%p3392_p9)
}
 0xfd9   : > { %s3461_s24 = smov 128   ;;  %s3462_s14 = smov 8  }
 0xfda   : > { %3011 = dma.vmem_to_hbm [thread:$0]  (%p4390_p0), %s4271_s25, 256, %s4269_s27, %s2436_s15, %s3461_s24, %s3461_s24, %s3462_s14  }
 0xfdb PF: > { %s4391_s20 = sld [smem:[#allocation15_spill]]  ;;  %s4392_s21 = sld [smem:[#allocation18_spill]] }
 0xfe1   : > { %s2464_s9 = sand.u32 1, %s4391_s20   ;;  %p4393_p10 = scmp.ne.s32.totalorder %s4392_s21, 0 }
 0xfe2   : > { %s2465_s16 = scalar_lea.sflag [#allocation4], %s2464_s9 }
 0xfe3   : > { %p3021_p1 = pnand %p2557_p4, %p4393_p10 }
 0xfe5   : > { %3421 = dma.done.wait (!%p3021_p1), %s2465_s16, 256  }
 0xfe6   : > { %3423 = vsyncadd (!%p3021_p1), %s2465_s16, 4294967040  ;;  %s4394_s30 = sld [smem:[#allocation16_spill]]  ;;  %s4395_s19 = sld [smem:[#allocation17_spill]] }
 0xfe7   : > { %s4396_s27 = smov %s3430_s28  ;;  %s4397_s28 = smov %s3434_s29 }
 0xfec   : > { %p22_p3 = scmp.ge.s32.totalorder %s4394_s30, 4   ;;  %s4398_s29 = smov %s4395_s19 }
 0xfee   :  { %24 = sbr.rel (!%p22_p3) target bundleno = 6 (0x6), region = 115 }
 0xff5   :  { %2470 = vsyncpa [#allocation3], 1 }
 0xff6   :  { %2472 = vsyncpa [#allocation3 + $0x1], 1 }
 0xff7   :  { %2473 = vsyncpa [#allocation6], 1 }
 0xff8   :  { %2474 = vsyncpa [#allocation4], 1 }
 0xff9   :  { %2476 = vsyncpa [#allocation4 + $0x1], 1 }

</bundles_post_ra>
